<compile_context>
chip_gen: v6e
topology: v6e:2x2x1
jax: 0.10.0
libtpu: 0.0.40
codegen_flags: <defaults>
</compile_context>

<pallas_src>
import math

import jax
import jax.numpy as jnp
from jax import lax
from jax.experimental import pallas as pl
from jax.experimental.pallas import tpu as pltpu

NEG_INF = -1000000000.0      # matches the torch attention_bias constant
PAD_NEG = -1.0e30            # bias on padded kv lanes: exp() underflows to exactly 0
LANE = 128
SUBLANE = 8

_D_FULL_UNROLL = 256         # fully unroll the D reduction up to this size
_KV_FULL_UNROLL = 8          # fully unroll the kv-chunk loop up to this many chunks


def _round_up(x, m):
    return (x + m - 1) // m * m


def _make_additive_kernel(TQ, TKV, n_kv, D):
    """Per (batch, q-tile): log-softmax additive-attention scores.

    Block shapes:
      qp_ref   : [1, TQ, D]        query side of linear_concat (scale/bias folded in)
      kpT_ref  : [1, D, Lkv_pad]   key side of linear_concat, d-major (Lkv on lanes)
      bias_ref : [1, 1, Lkv_pad]   mask bias + logit bias, PAD_NEG on kv pads
      w2_ref   : [D]  (SMEM)       linear_logit weight as scalars
      o_ref    : [1, TQ, Lkv_pad]  log-softmax scores (raw logits staged here first)
    """
    f32 = jnp.float32

    def kernel(qp_ref, kpT_ref, bias_ref, w2_ref, o_ref):

        def d_term(d, k0):
            # [TQ,1] + [1,TKV] broadcast -> [TQ,TKV]; tanh on EUP; scalar fma on VPU.
            qcol = qp_ref[0, :, pl.ds(d, 1)]                     # [TQ, 1]
            krow = kpT_ref[0, pl.ds(d, 1), pl.ds(k0, TKV)]       # [1, TKV]
            t = jnp.tanh(qcol + krow)
            return w2_ref[d] * t.astype(f32)                     # [TQ, TKV] f32

        def chunk_logits(k0):
            acc = jnp.zeros((TQ, TKV), f32)
            if D <= _D_FULL_UNROLL:
                for d in range(D):                               # static unroll
                    acc = acc + d_term(d, k0)
            else:
                # TODO(synk): rolled path for very large model_dim (dynamic
                # lane slice of qp); bounds code size at the cost of dynamic
                # indexing in the lane dim.
                acc = lax.fori_loop(0, D, lambda d, a: a + d_term(d, k0),
                                    acc, unroll=8)
            return acc + bias_ref[0, :, pl.ds(k0, TKV)]          # [TQ, TKV]

        def kv_step(k0, carry):
            m, l = carry
            logits = chunk_logits(k0)
            # Stage raw logits in the output block; fixed up in the epilogue.
            o_ref[0, :, pl.ds(k0, TKV)] = logits
            m_new = jnp.maximum(m, jnp.max(logits, axis=-1, keepdims=True))
            l = l * jnp.exp(m - m_new) + jnp.sum(
                jnp.exp(logits - m_new), axis=-1, keepdims=True)
            return m_new, l

        m0 = jnp.full((TQ, 1), -jnp.inf, f32)
        l0 = jnp.zeros((TQ, 1), f32)

        if n_kv <= _KV_FULL_UNROLL:
            carry = (m0, l0)
            for c in range(n_kv):                                # static unroll
                carry = kv_step(c * TKV, carry)
            m, l = carry
        else:
            def body(c, carry):
                return kv_step(pl.multiple_of(c * TKV, TKV), carry)
            m, l = lax.fori_loop(0, n_kv, body, (m0, l0))

        lse = m + jnp.log(l)                                     # [TQ, 1]

        def fix_chunk(k0):
            o_ref[0, :, pl.ds(k0, TKV)] = o_ref[0, :, pl.ds(k0, TKV)] - lse

        if n_kv <= _KV_FULL_UNROLL:
            for c in range(n_kv):
                fix_chunk(c * TKV)
        else:
            lax.fori_loop(
                0, n_kv,
                lambda c, z: (fix_chunk(pl.multiple_of(c * TKV, TKV)), z)[1], 0)

    return kernel


def multi_headed_additive_attention(key, value, query, mask, params, *,
                                    compute_dtype=jnp.float32):
    """Forward pass of MultiHeadedAttention with head_count == 1.

    key/value: [B, Lkv, D]   query: [B, Lq, D]   mask: [B, Lkv]
    Returns log-softmax additive-attention scores [B, Lq, Lkv].
    """
    # linear_values(value) / final_linear are computed by the torch module but
    # never reach the returned scores, so they are skipped here.
    del value
    f32 = jnp.float32
    hp = lax.Precision.HIGHEST
    B, Lq, D = query.shape
    Lkv = key.shape[1]

    # ---- Tiling -------------------------------------------------------------
    TQ = min(64, _round_up(Lq, SUBLANE))     # independent of D (no 3D temp anymore)
    TKV = LANE
    Lq_pad = _round_up(Lq, TQ)
    Lkv_pad = _round_up(Lkv, TKV)
    n_kv = Lkv_pad // TKV

    # ---- Fold linear_query / linear_keys into the split linear_concat -------
    # qp = ((query @ Wq^T + bq)/sqrt(D)) @ Wqc^T + b_concat
    #    = query @ (Wqc Wq)^T / sqrt(D) + (Wqc bq)/sqrt(D) + b_concat
    # kp = (key @ Wk^T + bk) @ Wkc^T = key @ (Wkc Wk)^T + Wkc bk
    wqc = params["w_concat"][:, :D].astype(f32)
    wkc = params["w_concat"][:, D:].astype(f32)
    inv_s = 1.0 / math.sqrt(D)               # dim_per_head == model_dim (1 head)
    wq_eff = jnp.dot(wqc, params["w_query"].astype(f32), precision=hp) * inv_s
    bq_eff = (jnp.dot(wqc, params["b_query"].astype(f32), precision=hp) * inv_s
              + params["b_concat"].astype(f32))
    wk_eff = jnp.dot(wkc, params["w_keys"].astype(f32), precision=hp)
    bk_eff = jnp.dot(wkc, params["b_keys"].astype(f32), precision=hp)

    # ---- One batched matmul per input, padding folded in up front -----------
    query_p = jnp.pad(query.astype(f32), ((0, 0), (0, Lq_pad - Lq), (0, 0)))
    key_p = jnp.pad(key.astype(f32), ((0, 0), (0, Lkv_pad - Lkv), (0, 0)))
    qp = jnp.dot(query_p, wq_eff.T, precision=hp) + bq_eff              # [B,Lq_pad,D]
    kpT = (jnp.einsum("ed,bld->bel", wk_eff, key_p, precision=hp)
           + bk_eff[None, :, None])                                     # [B,D,Lkv_pad]

    # attention_bias(mask) with the scalar linear_logit bias folded in.
    bias = (jnp.where(mask.astype(f32) == 0.0, NEG_INF, 1.0)
            + params["b_logit"].astype(f32)[0])
    bias = jnp.pad(bias, ((0, 0), (0, Lkv_pad - Lkv)), constant_values=PAD_NEG)
    bias = bias.reshape(B, 1, Lkv_pad)

    w2 = params["w_logit"].astype(f32).reshape(D)                       # SMEM scalars

    qp = qp.astype(compute_dtype)
    kpT = kpT.astype(compute_dtype)

    # ---- Explicit VMEM budget (double-buffered blocks + headroom) -----------
    cb = jnp.dtype(compute_dtype).itemsize
    vmem_need = (2 * TQ * D * cb              # qp block
                 + 2 * D * Lkv_pad * cb       # kpT block (largest resident)
                 + 2 * SUBLANE * Lkv_pad * 4  # bias block (sublane-padded)
                 + 2 * TQ * Lkv_pad * 4)      # out block
    vmem_limit = int(min(100 * 2**20,
                         max(32 * 2**20, vmem_need * 5 // 4 + (2 << 20))))

    kernel = _make_additive_kernel(TQ, TKV, n_kv, D)

    cost = pl.CostEstimate(
        flops=int(B * Lq_pad * Lkv_pad * (3 * D + 8)),
        transcendentals=int(B * Lq_pad * Lkv_pad * (D + 1)),
        bytes_accessed=int(qp.size * cb + kpT.size * cb + bias.size * 4
                           + 4 * D + 4 * B * Lq_pad * Lkv_pad),
    )

    out = pl.pallas_call(
        kernel,
        out_shape=jax.ShapeDtypeStruct((B, Lq_pad, Lkv_pad), f32),
        grid_spec=pltpu.PrefetchScalarGridSpec(
            num_scalar_prefetch=0,
            grid=(B, Lq_pad // TQ),
            in_specs=[
                pl.BlockSpec((1, TQ, D), lambda b, qi: (b, qi, 0)),        # qp
                pl.BlockSpec((1, D, Lkv_pad), lambda b, qi: (b, 0, 0)),    # kpT
                pl.BlockSpec((1, 1, Lkv_pad), lambda b, qi: (b, 0, 0)),    # bias
                pl.BlockSpec(memory_space=pltpu.MemorySpace.SMEM),         # w2
            ],
            out_specs=pl.BlockSpec((1, TQ, Lkv_pad), lambda b, qi: (b, qi, 0)),
        ),
        compiler_params=pltpu.CompilerParams(
            dimension_semantics=("parallel", "parallel"),
            vmem_limit_bytes=vmem_limit),
        cost_estimate=cost,
    )(qp, kpT, bias, w2)

    # dist.view(batch, query_len, key_len); no-op when shapes are pre-aligned.
    return out[:, :Lq, :Lkv]


def _reference(key, value, query, mask, params):
    """Pure-JAX reference of the full torch forward (head_count == 1)."""
    del value
    B, Lq, D = query.shape
    Lkv = key.shape[1]
    hp = lax.Precision.HIGHEST
    k = jnp.dot(key, params["w_keys"].T, precision=hp) + params["b_keys"]
    q = jnp.dot(query, params["w_query"].T, precision=hp) + params["b_query"]
    q = q / math.sqrt(D)
    qb = jnp.broadcast_to(q[:, :, None, :], (B, Lq, Lkv, D))
    kb = jnp.broadcast_to(k[:, None, :, :], (B, Lq, Lkv, D))
    combined = jnp.tanh(
        jnp.dot(jnp.concatenate([qb, kb], axis=-1), params["w_concat"].T,
                precision=hp) + params["b_concat"])
    logits = jnp.dot(combined, params["w_logit"].T, precision=hp)[..., 0] \
        + params["b_logit"][0]
    bias = jnp.where(mask == 0, NEG_INF, 1.0)[:, None, :]
    logits = logits + bias
    return jax.nn.log_softmax(logits, axis=-1)


if __name__ == "__main__":
    B, Lq, Lkv, D = 2, 8, 8, 32   # model_dim = 32, head_count = 1

    root = jax.random.PRNGKey(0)
    (kk, kv_, kq, km, kwk, kbk, kwv, kbv, kwq, kbq,
     kwc, kbc, kwl, kbl) = jax.random.split(root, 14)

    key_in = jax.random.normal(kk, (B, Lkv, D), dtype=jnp.float32)
    value_in = jax.random.normal(kv_, (B, Lkv, D), dtype=jnp.float32)
    query_in = jax.random.normal(kq, (B, Lq, D), dtype=jnp.float32)
    mask = (jax.random.uniform(km, (B, Lkv)) > 0.3).astype(jnp.float32)

    def uinit(kk_, shape, fan_in):
        b = 1.0 / math.sqrt(fan_in)
        return jax.random.uniform(kk_, shape, minval=-b, maxval=b, dtype=jnp.float32)

    params = {
        "w_keys": uinit(kwk, (D, D), D), "b_keys": uinit(kbk, (D,), D),
        "w_values": uinit(kwv, (D, D), D), "b_values": uinit(kbv, (D,), D),
        "w_query": uinit(kwq, (D, D), D), "b_query": uinit(kbq, (D,), D),
        "w_concat": uinit(kwc, (D, 2 * D), 2 * D),
        "b_concat": uinit(kbc, (D,), 2 * D),
        "w_logit": uinit(kwl, (1, D), D), "b_logit": uinit(kbl, (1,), D),
    }

    fwd = jax.jit(multi_headed_additive_attention)
    out = fwd(key_in, value_in, query_in, mask, params)
    out = jax.block_until_ready(out)

    ref = _reference(key_in, value_in, query_in, mask, params)
    assert out.shape == ref.shape == (B, Lq, Lkv), (out.shape, ref.shape)
    max_err = float(jnp.max(jnp.abs(out - ref)))
    assert jnp.allclose(out, ref, atol=1e-4, rtol=1e-4), max_err

    print("KERNEL_OK")
</pallas_src>

<mosaic_0001>
module attributes {stable_mosaic.version = 11 : i64} {
  func.func @kernel(%arg0: i32, %arg1: i32, %arg2: memref<1x8x32xf32, #tpu.memory_space<vmem>>, %arg3: memref<1x32x128xf32, #tpu.memory_space<vmem>>, %arg4: memref<1x1x128xf32, #tpu.memory_space<vmem>>, %arg5: memref<32xf32, #tpu.memory_space<smem>>, %arg6: memref<1x8x128xf32, #tpu.memory_space<vmem>>) attributes {dimension_semantics = [#tpu.dimension_semantics<parallel>, #tpu.dimension_semantics<parallel>], iteration_bounds = array<i64: 2, 1>, scalar_prefetch = 0 : i64, scratch_operands = 0 : i64, tpu.core_type = #tpu.core_type<tc>, window_params = [{transform_indices = @transform_0, window_bounds = array<i64: 1, 8, 32>}, {transform_indices = @transform_1, window_bounds = array<i64: 1, 32, 128>}, {transform_indices = @transform_2, window_bounds = array<i64: 1, 1, 128>}, {transform_indices = @transform_3, window_bounds = array<i64: 32>}, {transform_indices = @transform_4, window_bounds = array<i64: 1, 8, 128>}]} {
    %cst = arith.constant 0xFF800000 : f32
    %0 = vector.broadcast %cst : f32 to vector<8x1xf32>
    %cst_0 = arith.constant 0.000000e+00 : f32
    %1 = vector.broadcast %cst_0 : f32 to vector<8x1xf32>
    %cst_1 = arith.constant 0.000000e+00 : f32
    %2 = vector.broadcast %cst_1 : f32 to vector<8x128xf32>
    %c0 = arith.constant 0 : index
    %c0_2 = arith.constant 0 : index
    %c0_3 = arith.constant 0 : index
    %3 = vector.load %arg2[%c0, %c0_2, %c0_3] : memref<1x8x32xf32, #tpu.memory_space<vmem>>, vector<1x8x1xf32>
    %4 = vector.shape_cast %3 : vector<1x8x1xf32> to vector<8x1xf32>
    %c0_4 = arith.constant 0 : index
    %c0_5 = arith.constant 0 : index
    %c0_6 = arith.constant 0 : index
    %5 = vector.load %arg3[%c0_4, %c0_5, %c0_6] : memref<1x32x128xf32, #tpu.memory_space<vmem>>, vector<1x1x128xf32>
    %6 = vector.shape_cast %5 : vector<1x1x128xf32> to vector<1x128xf32>
    %7 = vector.broadcast %4 : vector<8x1xf32> to vector<8x128xf32>
    %8 = vector.broadcast %6 : vector<1x128xf32> to vector<8x128xf32>
    %9 = arith.addf %7, %8 : vector<8x128xf32>
    %10 = math.tanh %9 : vector<8x128xf32>
    %c0_7 = arith.constant 0 : index
    %11 = memref.load %arg5[%c0_7] : memref<32xf32, #tpu.memory_space<smem>>
    %12 = vector.broadcast %11 : f32 to vector<8x128xf32>
    %13 = arith.mulf %12, %10 : vector<8x128xf32>
    %14 = arith.addf %2, %13 : vector<8x128xf32>
    %c0_8 = arith.constant 0 : index
    %c0_9 = arith.constant 0 : index
    %c1 = arith.constant 1 : index
    %15 = vector.load %arg2[%c0_8, %c0_9, %c1] : memref<1x8x32xf32, #tpu.memory_space<vmem>>, vector<1x8x1xf32>
    %16 = vector.shape_cast %15 : vector<1x8x1xf32> to vector<8x1xf32>
    %c0_10 = arith.constant 0 : index
    %c1_11 = arith.constant 1 : index
    %c0_12 = arith.constant 0 : index
    %17 = vector.load %arg3[%c0_10, %c1_11, %c0_12] : memref<1x32x128xf32, #tpu.memory_space<vmem>>, vector<1x1x128xf32>
    %18 = vector.shape_cast %17 : vector<1x1x128xf32> to vector<1x128xf32>
    %19 = vector.broadcast %16 : vector<8x1xf32> to vector<8x128xf32>
    %20 = vector.broadcast %18 : vector<1x128xf32> to vector<8x128xf32>
    %21 = arith.addf %19, %20 : vector<8x128xf32>
    %22 = math.tanh %21 : vector<8x128xf32>
    %c1_13 = arith.constant 1 : index
    %23 = memref.load %arg5[%c1_13] : memref<32xf32, #tpu.memory_space<smem>>
    %24 = vector.broadcast %23 : f32 to vector<8x128xf32>
    %25 = arith.mulf %24, %22 : vector<8x128xf32>
    %26 = arith.addf %14, %25 : vector<8x128xf32>
    %c0_14 = arith.constant 0 : index
    %c0_15 = arith.constant 0 : index
    %c2 = arith.constant 2 : index
    %27 = vector.load %arg2[%c0_14, %c0_15, %c2] : memref<1x8x32xf32, #tpu.memory_space<vmem>>, vector<1x8x1xf32>
    %28 = vector.shape_cast %27 : vector<1x8x1xf32> to vector<8x1xf32>
    %c0_16 = arith.constant 0 : index
    %c2_17 = arith.constant 2 : index
    %c0_18 = arith.constant 0 : index
    %29 = vector.load %arg3[%c0_16, %c2_17, %c0_18] : memref<1x32x128xf32, #tpu.memory_space<vmem>>, vector<1x1x128xf32>
    %30 = vector.shape_cast %29 : vector<1x1x128xf32> to vector<1x128xf32>
    %31 = vector.broadcast %28 : vector<8x1xf32> to vector<8x128xf32>
    %32 = vector.broadcast %30 : vector<1x128xf32> to vector<8x128xf32>
    %33 = arith.addf %31, %32 : vector<8x128xf32>
    %34 = math.tanh %33 : vector<8x128xf32>
    %c2_19 = arith.constant 2 : index
    %35 = memref.load %arg5[%c2_19] : memref<32xf32, #tpu.memory_space<smem>>
    %36 = vector.broadcast %35 : f32 to vector<8x128xf32>
    %37 = arith.mulf %36, %34 : vector<8x128xf32>
    %38 = arith.addf %26, %37 : vector<8x128xf32>
    %c0_20 = arith.constant 0 : index
    %c0_21 = arith.constant 0 : index
    %c3 = arith.constant 3 : index
    %39 = vector.load %arg2[%c0_20, %c0_21, %c3] : memref<1x8x32xf32, #tpu.memory_space<vmem>>, vector<1x8x1xf32>
    %40 = vector.shape_cast %39 : vector<1x8x1xf32> to vector<8x1xf32>
    %c0_22 = arith.constant 0 : index
    %c3_23 = arith.constant 3 : index
    %c0_24 = arith.constant 0 : index
    %41 = vector.load %arg3[%c0_22, %c3_23, %c0_24] : memref<1x32x128xf32, #tpu.memory_space<vmem>>, vector<1x1x128xf32>
    %42 = vector.shape_cast %41 : vector<1x1x128xf32> to vector<1x128xf32>
    %43 = vector.broadcast %40 : vector<8x1xf32> to vector<8x128xf32>
    %44 = vector.broadcast %42 : vector<1x128xf32> to vector<8x128xf32>
    %45 = arith.addf %43, %44 : vector<8x128xf32>
    %46 = math.tanh %45 : vector<8x128xf32>
    %c3_25 = arith.constant 3 : index
    %47 = memref.load %arg5[%c3_25] : memref<32xf32, #tpu.memory_space<smem>>
    %48 = vector.broadcast %47 : f32 to vector<8x128xf32>
    %49 = arith.mulf %48, %46 : vector<8x128xf32>
    %50 = arith.addf %38, %49 : vector<8x128xf32>
    %c0_26 = arith.constant 0 : index
    %c0_27 = arith.constant 0 : index
    %c4 = arith.constant 4 : index
    %51 = vector.load %arg2[%c0_26, %c0_27, %c4] : memref<1x8x32xf32, #tpu.memory_space<vmem>>, vector<1x8x1xf32>
    %52 = vector.shape_cast %51 : vector<1x8x1xf32> to vector<8x1xf32>
    %c0_28 = arith.constant 0 : index
    %c4_29 = arith.constant 4 : index
    %c0_30 = arith.constant 0 : index
    %53 = vector.load %arg3[%c0_28, %c4_29, %c0_30] : memref<1x32x128xf32, #tpu.memory_space<vmem>>, vector<1x1x128xf32>
    %54 = vector.shape_cast %53 : vector<1x1x128xf32> to vector<1x128xf32>
    %55 = vector.broadcast %52 : vector<8x1xf32> to vector<8x128xf32>
    %56 = vector.broadcast %54 : vector<1x128xf32> to vector<8x128xf32>
    %57 = arith.addf %55, %56 : vector<8x128xf32>
    %58 = math.tanh %57 : vector<8x128xf32>
    %c4_31 = arith.constant 4 : index
    %59 = memref.load %arg5[%c4_31] : memref<32xf32, #tpu.memory_space<smem>>
    %60 = vector.broadcast %59 : f32 to vector<8x128xf32>
    %61 = arith.mulf %60, %58 : vector<8x128xf32>
    %62 = arith.addf %50, %61 : vector<8x128xf32>
    %c0_32 = arith.constant 0 : index
    %c0_33 = arith.constant 0 : index
    %c5 = arith.constant 5 : index
    %63 = vector.load %arg2[%c0_32, %c0_33, %c5] : memref<1x8x32xf32, #tpu.memory_space<vmem>>, vector<1x8x1xf32>
    %64 = vector.shape_cast %63 : vector<1x8x1xf32> to vector<8x1xf32>
    %c0_34 = arith.constant 0 : index
    %c5_35 = arith.constant 5 : index
    %c0_36 = arith.constant 0 : index
    %65 = vector.load %arg3[%c0_34, %c5_35, %c0_36] : memref<1x32x128xf32, #tpu.memory_space<vmem>>, vector<1x1x128xf32>
    %66 = vector.shape_cast %65 : vector<1x1x128xf32> to vector<1x128xf32>
    %67 = vector.broadcast %64 : vector<8x1xf32> to vector<8x128xf32>
    %68 = vector.broadcast %66 : vector<1x128xf32> to vector<8x128xf32>
    %69 = arith.addf %67, %68 : vector<8x128xf32>
    %70 = math.tanh %69 : vector<8x128xf32>
    %c5_37 = arith.constant 5 : index
    %71 = memref.load %arg5[%c5_37] : memref<32xf32, #tpu.memory_space<smem>>
    %72 = vector.broadcast %71 : f32 to vector<8x128xf32>
    %73 = arith.mulf %72, %70 : vector<8x128xf32>
    %74 = arith.addf %62, %73 : vector<8x128xf32>
    %c0_38 = arith.constant 0 : index
    %c0_39 = arith.constant 0 : index
    %c6 = arith.constant 6 : index
    %75 = vector.load %arg2[%c0_38, %c0_39, %c6] : memref<1x8x32xf32, #tpu.memory_space<vmem>>, vector<1x8x1xf32>
    %76 = vector.shape_cast %75 : vector<1x8x1xf32> to vector<8x1xf32>
    %c0_40 = arith.constant 0 : index
    %c6_41 = arith.constant 6 : index
    %c0_42 = arith.constant 0 : index
    %77 = vector.load %arg3[%c0_40, %c6_41, %c0_42] : memref<1x32x128xf32, #tpu.memory_space<vmem>>, vector<1x1x128xf32>
    %78 = vector.shape_cast %77 : vector<1x1x128xf32> to vector<1x128xf32>
    %79 = vector.broadcast %76 : vector<8x1xf32> to vector<8x128xf32>
    %80 = vector.broadcast %78 : vector<1x128xf32> to vector<8x128xf32>
    %81 = arith.addf %79, %80 : vector<8x128xf32>
    %82 = math.tanh %81 : vector<8x128xf32>
    %c6_43 = arith.constant 6 : index
    %83 = memref.load %arg5[%c6_43] : memref<32xf32, #tpu.memory_space<smem>>
    %84 = vector.broadcast %83 : f32 to vector<8x128xf32>
    %85 = arith.mulf %84, %82 : vector<8x128xf32>
    %86 = arith.addf %74, %85 : vector<8x128xf32>
    %c0_44 = arith.constant 0 : index
    %c0_45 = arith.constant 0 : index
    %c7 = arith.constant 7 : index
    %87 = vector.load %arg2[%c0_44, %c0_45, %c7] : memref<1x8x32xf32, #tpu.memory_space<vmem>>, vector<1x8x1xf32>
    %88 = vector.shape_cast %87 : vector<1x8x1xf32> to vector<8x1xf32>
    %c0_46 = arith.constant 0 : index
    %c7_47 = arith.constant 7 : index
    %c0_48 = arith.constant 0 : index
    %89 = vector.load %arg3[%c0_46, %c7_47, %c0_48] : memref<1x32x128xf32, #tpu.memory_space<vmem>>, vector<1x1x128xf32>
    %90 = vector.shape_cast %89 : vector<1x1x128xf32> to vector<1x128xf32>
    %91 = vector.broadcast %88 : vector<8x1xf32> to vector<8x128xf32>
    %92 = vector.broadcast %90 : vector<1x128xf32> to vector<8x128xf32>
    %93 = arith.addf %91, %92 : vector<8x128xf32>
    %94 = math.tanh %93 : vector<8x128xf32>
    %c7_49 = arith.constant 7 : index
    %95 = memref.load %arg5[%c7_49] : memref<32xf32, #tpu.memory_space<smem>>
    %96 = vector.broadcast %95 : f32 to vector<8x128xf32>
    %97 = arith.mulf %96, %94 : vector<8x128xf32>
    %98 = arith.addf %86, %97 : vector<8x128xf32>
    %c0_50 = arith.constant 0 : index
    %c0_51 = arith.constant 0 : index
    %c8 = arith.constant 8 : index
    %99 = vector.load %arg2[%c0_50, %c0_51, %c8] : memref<1x8x32xf32, #tpu.memory_space<vmem>>, vector<1x8x1xf32>
    %100 = vector.shape_cast %99 : vector<1x8x1xf32> to vector<8x1xf32>
    %c0_52 = arith.constant 0 : index
    %c8_53 = arith.constant 8 : index
    %c0_54 = arith.constant 0 : index
    %101 = vector.load %arg3[%c0_52, %c8_53, %c0_54] : memref<1x32x128xf32, #tpu.memory_space<vmem>>, vector<1x1x128xf32>
    %102 = vector.shape_cast %101 : vector<1x1x128xf32> to vector<1x128xf32>
    %103 = vector.broadcast %100 : vector<8x1xf32> to vector<8x128xf32>
    %104 = vector.broadcast %102 : vector<1x128xf32> to vector<8x128xf32>
    %105 = arith.addf %103, %104 : vector<8x128xf32>
    %106 = math.tanh %105 : vector<8x128xf32>
    %c8_55 = arith.constant 8 : index
    %107 = memref.load %arg5[%c8_55] : memref<32xf32, #tpu.memory_space<smem>>
    %108 = vector.broadcast %107 : f32 to vector<8x128xf32>
    %109 = arith.mulf %108, %106 : vector<8x128xf32>
    %110 = arith.addf %98, %109 : vector<8x128xf32>
    %c0_56 = arith.constant 0 : index
    %c0_57 = arith.constant 0 : index
    %c9 = arith.constant 9 : index
    %111 = vector.load %arg2[%c0_56, %c0_57, %c9] : memref<1x8x32xf32, #tpu.memory_space<vmem>>, vector<1x8x1xf32>
    %112 = vector.shape_cast %111 : vector<1x8x1xf32> to vector<8x1xf32>
    %c0_58 = arith.constant 0 : index
    %c9_59 = arith.constant 9 : index
    %c0_60 = arith.constant 0 : index
    %113 = vector.load %arg3[%c0_58, %c9_59, %c0_60] : memref<1x32x128xf32, #tpu.memory_space<vmem>>, vector<1x1x128xf32>
    %114 = vector.shape_cast %113 : vector<1x1x128xf32> to vector<1x128xf32>
    %115 = vector.broadcast %112 : vector<8x1xf32> to vector<8x128xf32>
    %116 = vector.broadcast %114 : vector<1x128xf32> to vector<8x128xf32>
    %117 = arith.addf %115, %116 : vector<8x128xf32>
    %118 = math.tanh %117 : vector<8x128xf32>
    %c9_61 = arith.constant 9 : index
    %119 = memref.load %arg5[%c9_61] : memref<32xf32, #tpu.memory_space<smem>>
    %120 = vector.broadcast %119 : f32 to vector<8x128xf32>
    %121 = arith.mulf %120, %118 : vector<8x128xf32>
    %122 = arith.addf %110, %121 : vector<8x128xf32>
    %c0_62 = arith.constant 0 : index
    %c0_63 = arith.constant 0 : index
    %c10 = arith.constant 10 : index
    %123 = vector.load %arg2[%c0_62, %c0_63, %c10] : memref<1x8x32xf32, #tpu.memory_space<vmem>>, vector<1x8x1xf32>
    %124 = vector.shape_cast %123 : vector<1x8x1xf32> to vector<8x1xf32>
    %c0_64 = arith.constant 0 : index
    %c10_65 = arith.constant 10 : index
    %c0_66 = arith.constant 0 : index
    %125 = vector.load %arg3[%c0_64, %c10_65, %c0_66] : memref<1x32x128xf32, #tpu.memory_space<vmem>>, vector<1x1x128xf32>
    %126 = vector.shape_cast %125 : vector<1x1x128xf32> to vector<1x128xf32>
    %127 = vector.broadcast %124 : vector<8x1xf32> to vector<8x128xf32>
    %128 = vector.broadcast %126 : vector<1x128xf32> to vector<8x128xf32>
    %129 = arith.addf %127, %128 : vector<8x128xf32>
    %130 = math.tanh %129 : vector<8x128xf32>
    %c10_67 = arith.constant 10 : index
    %131 = memref.load %arg5[%c10_67] : memref<32xf32, #tpu.memory_space<smem>>
    %132 = vector.broadcast %131 : f32 to vector<8x128xf32>
    %133 = arith.mulf %132, %130 : vector<8x128xf32>
    %134 = arith.addf %122, %133 : vector<8x128xf32>
    %c0_68 = arith.constant 0 : index
    %c0_69 = arith.constant 0 : index
    %c11 = arith.constant 11 : index
    %135 = vector.load %arg2[%c0_68, %c0_69, %c11] : memref<1x8x32xf32, #tpu.memory_space<vmem>>, vector<1x8x1xf32>
    %136 = vector.shape_cast %135 : vector<1x8x1xf32> to vector<8x1xf32>
    %c0_70 = arith.constant 0 : index
    %c11_71 = arith.constant 11 : index
    %c0_72 = arith.constant 0 : index
    %137 = vector.load %arg3[%c0_70, %c11_71, %c0_72] : memref<1x32x128xf32, #tpu.memory_space<vmem>>, vector<1x1x128xf32>
    %138 = vector.shape_cast %137 : vector<1x1x128xf32> to vector<1x128xf32>
    %139 = vector.broadcast %136 : vector<8x1xf32> to vector<8x128xf32>
    %140 = vector.broadcast %138 : vector<1x128xf32> to vector<8x128xf32>
    %141 = arith.addf %139, %140 : vector<8x128xf32>
    %142 = math.tanh %141 : vector<8x128xf32>
    %c11_73 = arith.constant 11 : index
    %143 = memref.load %arg5[%c11_73] : memref<32xf32, #tpu.memory_space<smem>>
    %144 = vector.broadcast %143 : f32 to vector<8x128xf32>
    %145 = arith.mulf %144, %142 : vector<8x128xf32>
    %146 = arith.addf %134, %145 : vector<8x128xf32>
    %c0_74 = arith.constant 0 : index
    %c0_75 = arith.constant 0 : index
    %c12 = arith.constant 12 : index
    %147 = vector.load %arg2[%c0_74, %c0_75, %c12] : memref<1x8x32xf32, #tpu.memory_space<vmem>>, vector<1x8x1xf32>
    %148 = vector.shape_cast %147 : vector<1x8x1xf32> to vector<8x1xf32>
    %c0_76 = arith.constant 0 : index
    %c12_77 = arith.constant 12 : index
    %c0_78 = arith.constant 0 : index
    %149 = vector.load %arg3[%c0_76, %c12_77, %c0_78] : memref<1x32x128xf32, #tpu.memory_space<vmem>>, vector<1x1x128xf32>
    %150 = vector.shape_cast %149 : vector<1x1x128xf32> to vector<1x128xf32>
    %151 = vector.broadcast %148 : vector<8x1xf32> to vector<8x128xf32>
    %152 = vector.broadcast %150 : vector<1x128xf32> to vector<8x128xf32>
    %153 = arith.addf %151, %152 : vector<8x128xf32>
    %154 = math.tanh %153 : vector<8x128xf32>
    %c12_79 = arith.constant 12 : index
    %155 = memref.load %arg5[%c12_79] : memref<32xf32, #tpu.memory_space<smem>>
    %156 = vector.broadcast %155 : f32 to vector<8x128xf32>
    %157 = arith.mulf %156, %154 : vector<8x128xf32>
    %158 = arith.addf %146, %157 : vector<8x128xf32>
    %c0_80 = arith.constant 0 : index
    %c0_81 = arith.constant 0 : index
    %c13 = arith.constant 13 : index
    %159 = vector.load %arg2[%c0_80, %c0_81, %c13] : memref<1x8x32xf32, #tpu.memory_space<vmem>>, vector<1x8x1xf32>
    %160 = vector.shape_cast %159 : vector<1x8x1xf32> to vector<8x1xf32>
    %c0_82 = arith.constant 0 : index
    %c13_83 = arith.constant 13 : index
    %c0_84 = arith.constant 0 : index
    %161 = vector.load %arg3[%c0_82, %c13_83, %c0_84] : memref<1x32x128xf32, #tpu.memory_space<vmem>>, vector<1x1x128xf32>
    %162 = vector.shape_cast %161 : vector<1x1x128xf32> to vector<1x128xf32>
    %163 = vector.broadcast %160 : vector<8x1xf32> to vector<8x128xf32>
    %164 = vector.broadcast %162 : vector<1x128xf32> to vector<8x128xf32>
    %165 = arith.addf %163, %164 : vector<8x128xf32>
    %166 = math.tanh %165 : vector<8x128xf32>
    %c13_85 = arith.constant 13 : index
    %167 = memref.load %arg5[%c13_85] : memref<32xf32, #tpu.memory_space<smem>>
    %168 = vector.broadcast %167 : f32 to vector<8x128xf32>
    %169 = arith.mulf %168, %166 : vector<8x128xf32>
    %170 = arith.addf %158, %169 : vector<8x128xf32>
    %c0_86 = arith.constant 0 : index
    %c0_87 = arith.constant 0 : index
    %c14 = arith.constant 14 : index
    %171 = vector.load %arg2[%c0_86, %c0_87, %c14] : memref<1x8x32xf32, #tpu.memory_space<vmem>>, vector<1x8x1xf32>
    %172 = vector.shape_cast %171 : vector<1x8x1xf32> to vector<8x1xf32>
    %c0_88 = arith.constant 0 : index
    %c14_89 = arith.constant 14 : index
    %c0_90 = arith.constant 0 : index
    %173 = vector.load %arg3[%c0_88, %c14_89, %c0_90] : memref<1x32x128xf32, #tpu.memory_space<vmem>>, vector<1x1x128xf32>
    %174 = vector.shape_cast %173 : vector<1x1x128xf32> to vector<1x128xf32>
    %175 = vector.broadcast %172 : vector<8x1xf32> to vector<8x128xf32>
    %176 = vector.broadcast %174 : vector<1x128xf32> to vector<8x128xf32>
    %177 = arith.addf %175, %176 : vector<8x128xf32>
    %178 = math.tanh %177 : vector<8x128xf32>
    %c14_91 = arith.constant 14 : index
    %179 = memref.load %arg5[%c14_91] : memref<32xf32, #tpu.memory_space<smem>>
    %180 = vector.broadcast %179 : f32 to vector<8x128xf32>
    %181 = arith.mulf %180, %178 : vector<8x128xf32>
    %182 = arith.addf %170, %181 : vector<8x128xf32>
    %c0_92 = arith.constant 0 : index
    %c0_93 = arith.constant 0 : index
    %c15 = arith.constant 15 : index
    %183 = vector.load %arg2[%c0_92, %c0_93, %c15] : memref<1x8x32xf32, #tpu.memory_space<vmem>>, vector<1x8x1xf32>
    %184 = vector.shape_cast %183 : vector<1x8x1xf32> to vector<8x1xf32>
    %c0_94 = arith.constant 0 : index
    %c15_95 = arith.constant 15 : index
    %c0_96 = arith.constant 0 : index
    %185 = vector.load %arg3[%c0_94, %c15_95, %c0_96] : memref<1x32x128xf32, #tpu.memory_space<vmem>>, vector<1x1x128xf32>
    %186 = vector.shape_cast %185 : vector<1x1x128xf32> to vector<1x128xf32>
    %187 = vector.broadcast %184 : vector<8x1xf32> to vector<8x128xf32>
    %188 = vector.broadcast %186 : vector<1x128xf32> to vector<8x128xf32>
    %189 = arith.addf %187, %188 : vector<8x128xf32>
    %190 = math.tanh %189 : vector<8x128xf32>
    %c15_97 = arith.constant 15 : index
    %191 = memref.load %arg5[%c15_97] : memref<32xf32, #tpu.memory_space<smem>>
    %192 = vector.broadcast %191 : f32 to vector<8x128xf32>
    %193 = arith.mulf %192, %190 : vector<8x128xf32>
    %194 = arith.addf %182, %193 : vector<8x128xf32>
    %c0_98 = arith.constant 0 : index
    %c0_99 = arith.constant 0 : index
    %c16 = arith.constant 16 : index
    %195 = vector.load %arg2[%c0_98, %c0_99, %c16] : memref<1x8x32xf32, #tpu.memory_space<vmem>>, vector<1x8x1xf32>
    %196 = vector.shape_cast %195 : vector<1x8x1xf32> to vector<8x1xf32>
    %c0_100 = arith.constant 0 : index
    %c16_101 = arith.constant 16 : index
    %c0_102 = arith.constant 0 : index
    %197 = vector.load %arg3[%c0_100, %c16_101, %c0_102] : memref<1x32x128xf32, #tpu.memory_space<vmem>>, vector<1x1x128xf32>
    %198 = vector.shape_cast %197 : vector<1x1x128xf32> to vector<1x128xf32>
    %199 = vector.broadcast %196 : vector<8x1xf32> to vector<8x128xf32>
    %200 = vector.broadcast %198 : vector<1x128xf32> to vector<8x128xf32>
    %201 = arith.addf %199, %200 : vector<8x128xf32>
    %202 = math.tanh %201 : vector<8x128xf32>
    %c16_103 = arith.constant 16 : index
    %203 = memref.load %arg5[%c16_103] : memref<32xf32, #tpu.memory_space<smem>>
    %204 = vector.broadcast %203 : f32 to vector<8x128xf32>
    %205 = arith.mulf %204, %202 : vector<8x128xf32>
    %206 = arith.addf %194, %205 : vector<8x128xf32>
    %c0_104 = arith.constant 0 : index
    %c0_105 = arith.constant 0 : index
    %c17 = arith.constant 17 : index
    %207 = vector.load %arg2[%c0_104, %c0_105, %c17] : memref<1x8x32xf32, #tpu.memory_space<vmem>>, vector<1x8x1xf32>
    %208 = vector.shape_cast %207 : vector<1x8x1xf32> to vector<8x1xf32>
    %c0_106 = arith.constant 0 : index
    %c17_107 = arith.constant 17 : index
    %c0_108 = arith.constant 0 : index
    %209 = vector.load %arg3[%c0_106, %c17_107, %c0_108] : memref<1x32x128xf32, #tpu.memory_space<vmem>>, vector<1x1x128xf32>
    %210 = vector.shape_cast %209 : vector<1x1x128xf32> to vector<1x128xf32>
    %211 = vector.broadcast %208 : vector<8x1xf32> to vector<8x128xf32>
    %212 = vector.broadcast %210 : vector<1x128xf32> to vector<8x128xf32>
    %213 = arith.addf %211, %212 : vector<8x128xf32>
    %214 = math.tanh %213 : vector<8x128xf32>
    %c17_109 = arith.constant 17 : index
    %215 = memref.load %arg5[%c17_109] : memref<32xf32, #tpu.memory_space<smem>>
    %216 = vector.broadcast %215 : f32 to vector<8x128xf32>
    %217 = arith.mulf %216, %214 : vector<8x128xf32>
    %218 = arith.addf %206, %217 : vector<8x128xf32>
    %c0_110 = arith.constant 0 : index
    %c0_111 = arith.constant 0 : index
    %c18 = arith.constant 18 : index
    %219 = vector.load %arg2[%c0_110, %c0_111, %c18] : memref<1x8x32xf32, #tpu.memory_space<vmem>>, vector<1x8x1xf32>
    %220 = vector.shape_cast %219 : vector<1x8x1xf32> to vector<8x1xf32>
    %c0_112 = arith.constant 0 : index
    %c18_113 = arith.constant 18 : index
    %c0_114 = arith.constant 0 : index
    %221 = vector.load %arg3[%c0_112, %c18_113, %c0_114] : memref<1x32x128xf32, #tpu.memory_space<vmem>>, vector<1x1x128xf32>
    %222 = vector.shape_cast %221 : vector<1x1x128xf32> to vector<1x128xf32>
    %223 = vector.broadcast %220 : vector<8x1xf32> to vector<8x128xf32>
    %224 = vector.broadcast %222 : vector<1x128xf32> to vector<8x128xf32>
    %225 = arith.addf %223, %224 : vector<8x128xf32>
    %226 = math.tanh %225 : vector<8x128xf32>
    %c18_115 = arith.constant 18 : index
    %227 = memref.load %arg5[%c18_115] : memref<32xf32, #tpu.memory_space<smem>>
    %228 = vector.broadcast %227 : f32 to vector<8x128xf32>
    %229 = arith.mulf %228, %226 : vector<8x128xf32>
    %230 = arith.addf %218, %229 : vector<8x128xf32>
    %c0_116 = arith.constant 0 : index
    %c0_117 = arith.constant 0 : index
    %c19 = arith.constant 19 : index
    %231 = vector.load %arg2[%c0_116, %c0_117, %c19] : memref<1x8x32xf32, #tpu.memory_space<vmem>>, vector<1x8x1xf32>
    %232 = vector.shape_cast %231 : vector<1x8x1xf32> to vector<8x1xf32>
    %c0_118 = arith.constant 0 : index
    %c19_119 = arith.constant 19 : index
    %c0_120 = arith.constant 0 : index
    %233 = vector.load %arg3[%c0_118, %c19_119, %c0_120] : memref<1x32x128xf32, #tpu.memory_space<vmem>>, vector<1x1x128xf32>
    %234 = vector.shape_cast %233 : vector<1x1x128xf32> to vector<1x128xf32>
    %235 = vector.broadcast %232 : vector<8x1xf32> to vector<8x128xf32>
    %236 = vector.broadcast %234 : vector<1x128xf32> to vector<8x128xf32>
    %237 = arith.addf %235, %236 : vector<8x128xf32>
    %238 = math.tanh %237 : vector<8x128xf32>
    %c19_121 = arith.constant 19 : index
    %239 = memref.load %arg5[%c19_121] : memref<32xf32, #tpu.memory_space<smem>>
    %240 = vector.broadcast %239 : f32 to vector<8x128xf32>
    %241 = arith.mulf %240, %238 : vector<8x128xf32>
    %242 = arith.addf %230, %241 : vector<8x128xf32>
    %c0_122 = arith.constant 0 : index
    %c0_123 = arith.constant 0 : index
    %c20 = arith.constant 20 : index
    %243 = vector.load %arg2[%c0_122, %c0_123, %c20] : memref<1x8x32xf32, #tpu.memory_space<vmem>>, vector<1x8x1xf32>
    %244 = vector.shape_cast %243 : vector<1x8x1xf32> to vector<8x1xf32>
    %c0_124 = arith.constant 0 : index
    %c20_125 = arith.constant 20 : index
    %c0_126 = arith.constant 0 : index
    %245 = vector.load %arg3[%c0_124, %c20_125, %c0_126] : memref<1x32x128xf32, #tpu.memory_space<vmem>>, vector<1x1x128xf32>
    %246 = vector.shape_cast %245 : vector<1x1x128xf32> to vector<1x128xf32>
    %247 = vector.broadcast %244 : vector<8x1xf32> to vector<8x128xf32>
    %248 = vector.broadcast %246 : vector<1x128xf32> to vector<8x128xf32>
    %249 = arith.addf %247, %248 : vector<8x128xf32>
    %250 = math.tanh %249 : vector<8x128xf32>
    %c20_127 = arith.constant 20 : index
    %251 = memref.load %arg5[%c20_127] : memref<32xf32, #tpu.memory_space<smem>>
    %252 = vector.broadcast %251 : f32 to vector<8x128xf32>
    %253 = arith.mulf %252, %250 : vector<8x128xf32>
    %254 = arith.addf %242, %253 : vector<8x128xf32>
    %c0_128 = arith.constant 0 : index
    %c0_129 = arith.constant 0 : index
    %c21 = arith.constant 21 : index
    %255 = vector.load %arg2[%c0_128, %c0_129, %c21] : memref<1x8x32xf32, #tpu.memory_space<vmem>>, vector<1x8x1xf32>
    %256 = vector.shape_cast %255 : vector<1x8x1xf32> to vector<8x1xf32>
    %c0_130 = arith.constant 0 : index
    %c21_131 = arith.constant 21 : index
    %c0_132 = arith.constant 0 : index
    %257 = vector.load %arg3[%c0_130, %c21_131, %c0_132] : memref<1x32x128xf32, #tpu.memory_space<vmem>>, vector<1x1x128xf32>
    %258 = vector.shape_cast %257 : vector<1x1x128xf32> to vector<1x128xf32>
    %259 = vector.broadcast %256 : vector<8x1xf32> to vector<8x128xf32>
    %260 = vector.broadcast %258 : vector<1x128xf32> to vector<8x128xf32>
    %261 = arith.addf %259, %260 : vector<8x128xf32>
    %262 = math.tanh %261 : vector<8x128xf32>
    %c21_133 = arith.constant 21 : index
    %263 = memref.load %arg5[%c21_133] : memref<32xf32, #tpu.memory_space<smem>>
    %264 = vector.broadcast %263 : f32 to vector<8x128xf32>
    %265 = arith.mulf %264, %262 : vector<8x128xf32>
    %266 = arith.addf %254, %265 : vector<8x128xf32>
    %c0_134 = arith.constant 0 : index
    %c0_135 = arith.constant 0 : index
    %c22 = arith.constant 22 : index
    %267 = vector.load %arg2[%c0_134, %c0_135, %c22] : memref<1x8x32xf32, #tpu.memory_space<vmem>>, vector<1x8x1xf32>
    %268 = vector.shape_cast %267 : vector<1x8x1xf32> to vector<8x1xf32>
    %c0_136 = arith.constant 0 : index
    %c22_137 = arith.constant 22 : index
    %c0_138 = arith.constant 0 : index
    %269 = vector.load %arg3[%c0_136, %c22_137, %c0_138] : memref<1x32x128xf32, #tpu.memory_space<vmem>>, vector<1x1x128xf32>
    %270 = vector.shape_cast %269 : vector<1x1x128xf32> to vector<1x128xf32>
    %271 = vector.broadcast %268 : vector<8x1xf32> to vector<8x128xf32>
    %272 = vector.broadcast %270 : vector<1x128xf32> to vector<8x128xf32>
    %273 = arith.addf %271, %272 : vector<8x128xf32>
    %274 = math.tanh %273 : vector<8x128xf32>
    %c22_139 = arith.constant 22 : index
    %275 = memref.load %arg5[%c22_139] : memref<32xf32, #tpu.memory_space<smem>>
    %276 = vector.broadcast %275 : f32 to vector<8x128xf32>
    %277 = arith.mulf %276, %274 : vector<8x128xf32>
    %278 = arith.addf %266, %277 : vector<8x128xf32>
    %c0_140 = arith.constant 0 : index
    %c0_141 = arith.constant 0 : index
    %c23 = arith.constant 23 : index
    %279 = vector.load %arg2[%c0_140, %c0_141, %c23] : memref<1x8x32xf32, #tpu.memory_space<vmem>>, vector<1x8x1xf32>
    %280 = vector.shape_cast %279 : vector<1x8x1xf32> to vector<8x1xf32>
    %c0_142 = arith.constant 0 : index
    %c23_143 = arith.constant 23 : index
    %c0_144 = arith.constant 0 : index
    %281 = vector.load %arg3[%c0_142, %c23_143, %c0_144] : memref<1x32x128xf32, #tpu.memory_space<vmem>>, vector<1x1x128xf32>
    %282 = vector.shape_cast %281 : vector<1x1x128xf32> to vector<1x128xf32>
    %283 = vector.broadcast %280 : vector<8x1xf32> to vector<8x128xf32>
    %284 = vector.broadcast %282 : vector<1x128xf32> to vector<8x128xf32>
    %285 = arith.addf %283, %284 : vector<8x128xf32>
    %286 = math.tanh %285 : vector<8x128xf32>
    %c23_145 = arith.constant 23 : index
    %287 = memref.load %arg5[%c23_145] : memref<32xf32, #tpu.memory_space<smem>>
    %288 = vector.broadcast %287 : f32 to vector<8x128xf32>
    %289 = arith.mulf %288, %286 : vector<8x128xf32>
    %290 = arith.addf %278, %289 : vector<8x128xf32>
    %c0_146 = arith.constant 0 : index
    %c0_147 = arith.constant 0 : index
    %c24 = arith.constant 24 : index
    %291 = vector.load %arg2[%c0_146, %c0_147, %c24] : memref<1x8x32xf32, #tpu.memory_space<vmem>>, vector<1x8x1xf32>
    %292 = vector.shape_cast %291 : vector<1x8x1xf32> to vector<8x1xf32>
    %c0_148 = arith.constant 0 : index
    %c24_149 = arith.constant 24 : index
    %c0_150 = arith.constant 0 : index
    %293 = vector.load %arg3[%c0_148, %c24_149, %c0_150] : memref<1x32x128xf32, #tpu.memory_space<vmem>>, vector<1x1x128xf32>
    %294 = vector.shape_cast %293 : vector<1x1x128xf32> to vector<1x128xf32>
    %295 = vector.broadcast %292 : vector<8x1xf32> to vector<8x128xf32>
    %296 = vector.broadcast %294 : vector<1x128xf32> to vector<8x128xf32>
    %297 = arith.addf %295, %296 : vector<8x128xf32>
    %298 = math.tanh %297 : vector<8x128xf32>
    %c24_151 = arith.constant 24 : index
    %299 = memref.load %arg5[%c24_151] : memref<32xf32, #tpu.memory_space<smem>>
    %300 = vector.broadcast %299 : f32 to vector<8x128xf32>
    %301 = arith.mulf %300, %298 : vector<8x128xf32>
    %302 = arith.addf %290, %301 : vector<8x128xf32>
    %c0_152 = arith.constant 0 : index
    %c0_153 = arith.constant 0 : index
    %c25 = arith.constant 25 : index
    %303 = vector.load %arg2[%c0_152, %c0_153, %c25] : memref<1x8x32xf32, #tpu.memory_space<vmem>>, vector<1x8x1xf32>
    %304 = vector.shape_cast %303 : vector<1x8x1xf32> to vector<8x1xf32>
    %c0_154 = arith.constant 0 : index
    %c25_155 = arith.constant 25 : index
    %c0_156 = arith.constant 0 : index
    %305 = vector.load %arg3[%c0_154, %c25_155, %c0_156] : memref<1x32x128xf32, #tpu.memory_space<vmem>>, vector<1x1x128xf32>
    %306 = vector.shape_cast %305 : vector<1x1x128xf32> to vector<1x128xf32>
    %307 = vector.broadcast %304 : vector<8x1xf32> to vector<8x128xf32>
    %308 = vector.broadcast %306 : vector<1x128xf32> to vector<8x128xf32>
    %309 = arith.addf %307, %308 : vector<8x128xf32>
    %310 = math.tanh %309 : vector<8x128xf32>
    %c25_157 = arith.constant 25 : index
    %311 = memref.load %arg5[%c25_157] : memref<32xf32, #tpu.memory_space<smem>>
    %312 = vector.broadcast %311 : f32 to vector<8x128xf32>
    %313 = arith.mulf %312, %310 : vector<8x128xf32>
    %314 = arith.addf %302, %313 : vector<8x128xf32>
    %c0_158 = arith.constant 0 : index
    %c0_159 = arith.constant 0 : index
    %c26 = arith.constant 26 : index
    %315 = vector.load %arg2[%c0_158, %c0_159, %c26] : memref<1x8x32xf32, #tpu.memory_space<vmem>>, vector<1x8x1xf32>
    %316 = vector.shape_cast %315 : vector<1x8x1xf32> to vector<8x1xf32>
    %c0_160 = arith.constant 0 : index
    %c26_161 = arith.constant 26 : index
    %c0_162 = arith.constant 0 : index
    %317 = vector.load %arg3[%c0_160, %c26_161, %c0_162] : memref<1x32x128xf32, #tpu.memory_space<vmem>>, vector<1x1x128xf32>
    %318 = vector.shape_cast %317 : vector<1x1x128xf32> to vector<1x128xf32>
    %319 = vector.broadcast %316 : vector<8x1xf32> to vector<8x128xf32>
    %320 = vector.broadcast %318 : vector<1x128xf32> to vector<8x128xf32>
    %321 = arith.addf %319, %320 : vector<8x128xf32>
    %322 = math.tanh %321 : vector<8x128xf32>
    %c26_163 = arith.constant 26 : index
    %323 = memref.load %arg5[%c26_163] : memref<32xf32, #tpu.memory_space<smem>>
    %324 = vector.broadcast %323 : f32 to vector<8x128xf32>
    %325 = arith.mulf %324, %322 : vector<8x128xf32>
    %326 = arith.addf %314, %325 : vector<8x128xf32>
    %c0_164 = arith.constant 0 : index
    %c0_165 = arith.constant 0 : index
    %c27 = arith.constant 27 : index
    %327 = vector.load %arg2[%c0_164, %c0_165, %c27] : memref<1x8x32xf32, #tpu.memory_space<vmem>>, vector<1x8x1xf32>
    %328 = vector.shape_cast %327 : vector<1x8x1xf32> to vector<8x1xf32>
    %c0_166 = arith.constant 0 : index
    %c27_167 = arith.constant 27 : index
    %c0_168 = arith.constant 0 : index
    %329 = vector.load %arg3[%c0_166, %c27_167, %c0_168] : memref<1x32x128xf32, #tpu.memory_space<vmem>>, vector<1x1x128xf32>
    %330 = vector.shape_cast %329 : vector<1x1x128xf32> to vector<1x128xf32>
    %331 = vector.broadcast %328 : vector<8x1xf32> to vector<8x128xf32>
    %332 = vector.broadcast %330 : vector<1x128xf32> to vector<8x128xf32>
    %333 = arith.addf %331, %332 : vector<8x128xf32>
    %334 = math.tanh %333 : vector<8x128xf32>
    %c27_169 = arith.constant 27 : index
    %335 = memref.load %arg5[%c27_169] : memref<32xf32, #tpu.memory_space<smem>>
    %336 = vector.broadcast %335 : f32 to vector<8x128xf32>
    %337 = arith.mulf %336, %334 : vector<8x128xf32>
    %338 = arith.addf %326, %337 : vector<8x128xf32>
    %c0_170 = arith.constant 0 : index
    %c0_171 = arith.constant 0 : index
    %c28 = arith.constant 28 : index
    %339 = vector.load %arg2[%c0_170, %c0_171, %c28] : memref<1x8x32xf32, #tpu.memory_space<vmem>>, vector<1x8x1xf32>
    %340 = vector.shape_cast %339 : vector<1x8x1xf32> to vector<8x1xf32>
    %c0_172 = arith.constant 0 : index
    %c28_173 = arith.constant 28 : index
    %c0_174 = arith.constant 0 : index
    %341 = vector.load %arg3[%c0_172, %c28_173, %c0_174] : memref<1x32x128xf32, #tpu.memory_space<vmem>>, vector<1x1x128xf32>
    %342 = vector.shape_cast %341 : vector<1x1x128xf32> to vector<1x128xf32>
    %343 = vector.broadcast %340 : vector<8x1xf32> to vector<8x128xf32>
    %344 = vector.broadcast %342 : vector<1x128xf32> to vector<8x128xf32>
    %345 = arith.addf %343, %344 : vector<8x128xf32>
    %346 = math.tanh %345 : vector<8x128xf32>
    %c28_175 = arith.constant 28 : index
    %347 = memref.load %arg5[%c28_175] : memref<32xf32, #tpu.memory_space<smem>>
    %348 = vector.broadcast %347 : f32 to vector<8x128xf32>
    %349 = arith.mulf %348, %346 : vector<8x128xf32>
    %350 = arith.addf %338, %349 : vector<8x128xf32>
    %c0_176 = arith.constant 0 : index
    %c0_177 = arith.constant 0 : index
    %c29 = arith.constant 29 : index
    %351 = vector.load %arg2[%c0_176, %c0_177, %c29] : memref<1x8x32xf32, #tpu.memory_space<vmem>>, vector<1x8x1xf32>
    %352 = vector.shape_cast %351 : vector<1x8x1xf32> to vector<8x1xf32>
    %c0_178 = arith.constant 0 : index
    %c29_179 = arith.constant 29 : index
    %c0_180 = arith.constant 0 : index
    %353 = vector.load %arg3[%c0_178, %c29_179, %c0_180] : memref<1x32x128xf32, #tpu.memory_space<vmem>>, vector<1x1x128xf32>
    %354 = vector.shape_cast %353 : vector<1x1x128xf32> to vector<1x128xf32>
    %355 = vector.broadcast %352 : vector<8x1xf32> to vector<8x128xf32>
    %356 = vector.broadcast %354 : vector<1x128xf32> to vector<8x128xf32>
    %357 = arith.addf %355, %356 : vector<8x128xf32>
    %358 = math.tanh %357 : vector<8x128xf32>
    %c29_181 = arith.constant 29 : index
    %359 = memref.load %arg5[%c29_181] : memref<32xf32, #tpu.memory_space<smem>>
    %360 = vector.broadcast %359 : f32 to vector<8x128xf32>
    %361 = arith.mulf %360, %358 : vector<8x128xf32>
    %362 = arith.addf %350, %361 : vector<8x128xf32>
    %c0_182 = arith.constant 0 : index
    %c0_183 = arith.constant 0 : index
    %c30 = arith.constant 30 : index
    %363 = vector.load %arg2[%c0_182, %c0_183, %c30] : memref<1x8x32xf32, #tpu.memory_space<vmem>>, vector<1x8x1xf32>
    %364 = vector.shape_cast %363 : vector<1x8x1xf32> to vector<8x1xf32>
    %c0_184 = arith.constant 0 : index
    %c30_185 = arith.constant 30 : index
    %c0_186 = arith.constant 0 : index
    %365 = vector.load %arg3[%c0_184, %c30_185, %c0_186] : memref<1x32x128xf32, #tpu.memory_space<vmem>>, vector<1x1x128xf32>
    %366 = vector.shape_cast %365 : vector<1x1x128xf32> to vector<1x128xf32>
    %367 = vector.broadcast %364 : vector<8x1xf32> to vector<8x128xf32>
    %368 = vector.broadcast %366 : vector<1x128xf32> to vector<8x128xf32>
    %369 = arith.addf %367, %368 : vector<8x128xf32>
    %370 = math.tanh %369 : vector<8x128xf32>
    %c30_187 = arith.constant 30 : index
    %371 = memref.load %arg5[%c30_187] : memref<32xf32, #tpu.memory_space<smem>>
    %372 = vector.broadcast %371 : f32 to vector<8x128xf32>
    %373 = arith.mulf %372, %370 : vector<8x128xf32>
    %374 = arith.addf %362, %373 : vector<8x128xf32>
    %c0_188 = arith.constant 0 : index
    %c0_189 = arith.constant 0 : index
    %c31 = arith.constant 31 : index
    %375 = vector.load %arg2[%c0_188, %c0_189, %c31] : memref<1x8x32xf32, #tpu.memory_space<vmem>>, vector<1x8x1xf32>
    %376 = vector.shape_cast %375 : vector<1x8x1xf32> to vector<8x1xf32>
    %c0_190 = arith.constant 0 : index
    %c31_191 = arith.constant 31 : index
    %c0_192 = arith.constant 0 : index
    %377 = vector.load %arg3[%c0_190, %c31_191, %c0_192] : memref<1x32x128xf32, #tpu.memory_space<vmem>>, vector<1x1x128xf32>
    %378 = vector.shape_cast %377 : vector<1x1x128xf32> to vector<1x128xf32>
    %379 = vector.broadcast %376 : vector<8x1xf32> to vector<8x128xf32>
    %380 = vector.broadcast %378 : vector<1x128xf32> to vector<8x128xf32>
    %381 = arith.addf %379, %380 : vector<8x128xf32>
    %382 = math.tanh %381 : vector<8x128xf32>
    %c31_193 = arith.constant 31 : index
    %383 = memref.load %arg5[%c31_193] : memref<32xf32, #tpu.memory_space<smem>>
    %384 = vector.broadcast %383 : f32 to vector<8x128xf32>
    %385 = arith.mulf %384, %382 : vector<8x128xf32>
    %386 = arith.addf %374, %385 : vector<8x128xf32>
    %c0_194 = arith.constant 0 : index
    %c0_195 = arith.constant 0 : index
    %c0_196 = arith.constant 0 : index
    %387 = vector.load %arg4[%c0_194, %c0_195, %c0_196] : memref<1x1x128xf32, #tpu.memory_space<vmem>>, vector<1x1x128xf32>
    %388 = vector.shape_cast %387 : vector<1x1x128xf32> to vector<1x128xf32>
    %389 = vector.broadcast %388 : vector<1x128xf32> to vector<8x128xf32>
    %390 = arith.addf %386, %389 : vector<8x128xf32>
    %c0_197 = arith.constant 0 : index
    %c0_198 = arith.constant 0 : index
    %c0_199 = arith.constant 0 : index
    %391 = vector.load %arg6[%c0_197, %c0_198, %c0_199] : memref<1x8x128xf32, #tpu.memory_space<vmem>>, vector<1x8x128xf32>
    %392 = vector.shape_cast %391 : vector<1x8x128xf32> to vector<8x128xf32>
    %393 = vector.shape_cast %390 : vector<8x128xf32> to vector<1x8x128xf32>
    tpu.vector_store %arg6[%c0_197, %c0_198, %c0_199], %393 {strides = array<i32>} : memref<1x8x128xf32, #tpu.memory_space<vmem>>, vector<1x8x128xf32>,
    %cst_200 = arith.constant dense<0xFF800000> : vector<8xf32>
    %394 = vector.multi_reduction <maximumf>, %390, %cst_200 [1] : vector<8x128xf32> to vector<8xf32>
    %395 = vector.shape_cast %394 : vector<8xf32> to vector<8x1xf32>
    %396 = arith.maximumf %0, %395 : vector<8x1xf32>
    %397 = arith.subf %0, %396 : vector<8x1xf32>
    %398 = math.exp %397 : vector<8x1xf32>
    %399 = arith.mulf %1, %398 : vector<8x1xf32>
    %400 = vector.broadcast %396 : vector<8x1xf32> to vector<8x128xf32>
    %401 = arith.subf %390, %400 : vector<8x128xf32>
    %402 = math.exp %401 : vector<8x128xf32>
    %cst_201 = arith.constant dense<0.000000e+00> : vector<8xf32>
    %403 = vector.multi_reduction <add>, %402, %cst_201 [1] : vector<8x128xf32> to vector<8xf32>
    %404 = vector.shape_cast %403 : vector<8xf32> to vector<8x1xf32>
    %405 = arith.addf %399, %404 : vector<8x1xf32>
    %406 = math.log %405 : vector<8x1xf32>
    %407 = arith.addf %396, %406 : vector<8x1xf32>
    %c0_202 = arith.constant 0 : index
    %c0_203 = arith.constant 0 : index
    %c0_204 = arith.constant 0 : index
    %408 = vector.load %arg6[%c0_202, %c0_203, %c0_204] : memref<1x8x128xf32, #tpu.memory_space<vmem>>, vector<1x8x128xf32>
    %409 = vector.shape_cast %408 : vector<1x8x128xf32> to vector<8x128xf32>
    %410 = vector.broadcast %407 : vector<8x1xf32> to vector<8x128xf32>
    %411 = arith.subf %409, %410 : vector<8x128xf32>
    %c0_205 = arith.constant 0 : index
    %c0_206 = arith.constant 0 : index
    %c0_207 = arith.constant 0 : index
    %412 = vector.load %arg6[%c0_205, %c0_206, %c0_207] : memref<1x8x128xf32, #tpu.memory_space<vmem>>, vector<1x8x128xf32>
    %413 = vector.shape_cast %412 : vector<1x8x128xf32> to vector<8x128xf32>
    %414 = vector.shape_cast %411 : vector<8x128xf32> to vector<1x8x128xf32>
    tpu.vector_store %arg6[%c0_205, %c0_206, %c0_207], %414 {strides = array<i32>} : memref<1x8x128xf32, #tpu.memory_space<vmem>>, vector<1x8x128xf32>,
    return
  }
  func.func @transform_0(%arg0: i32, %arg1: i32) -> (i32, i32, i32) {
    %c0_i32 = arith.constant 0 : i32
    %c0_i32_0 = arith.constant 0 : i32
    return %arg0, %arg1, %c0_i32 : i32, i32, i32
  }
  func.func @transform_1(%arg0: i32, %arg1: i32) -> (i32, i32, i32) {
    %c0_i32 = arith.constant 0 : i32
    %c0_i32_0 = arith.constant 0 : i32
    %c0_i32_1 = arith.constant 0 : i32
    return %arg0, %c0_i32, %c0_i32_0 : i32, i32, i32
  }
  func.func @transform_2(%arg0: i32, %arg1: i32) -> (i32, i32, i32) {
    %c0_i32 = arith.constant 0 : i32
    %c0_i32_0 = arith.constant 0 : i32
    %c0_i32_1 = arith.constant 0 : i32
    return %arg0, %c0_i32, %c0_i32_0 : i32, i32, i32
  }
  func.func @transform_3(%arg0: i32, %arg1: i32) -> i32 {
    %c0_i32 = arith.constant 0 : i32
    %c0_i32_0 = arith.constant 0 : i32
    return %c0_i32 : i32
  }
  func.func @transform_4(%arg0: i32, %arg1: i32) -> (i32, i32, i32) {
    %c0_i32 = arith.constant 0 : i32
    %c0_i32_0 = arith.constant 0 : i32
    return %arg0, %arg1, %c0_i32 : i32, i32, i32
  }
}

</mosaic_0001>

<bundles_post_ra>
// kernel: multi_headed_additive_attention.1
= control target key start
LH: loop header
LB: loop body
LE: loop exit
PB: predicated region body
PF: predicated region fallthrough
CT: control target
= control target key end

     0   :  { %9 = vsyncpa [#allocation4], 0  ;;  %s1563_s0 = inlined_call_operand.vmem [shape: f32[2,8,32], index: 0, kind: input, shape index: {}]   ;;  %s1564_s1 = inlined_call_operand.vmem [shape: f32[2,32,128], index: 1, kind: input, shape index: {}]   ;;  %s1565_s2 = inlined_call_operand.vmem [shape: f32[2,1,128], index: 2, kind: input, shape index: {}]   ;;  %s1566_s3 = inlined_call_operand.vmem [shape: f32[32], index: 3, kind: input, shape index: {}]   ;;  %s1567_s4 = inlined_call_operand.hbm [shape: f32[2,8,128], index: 4, kind: output, shape index: {}]  }
   0x1   :  { %10 = vsyncpa [#allocation3], 0 }
   0x2   :  { %12 = vsyncpa [#allocation3 + $0x1], 0  ;;  %s1331_s15 = smov 0   ;;  %s1333_s16 = smov 0  }
   0x3   :  { %s1335_s17 = smov 0   ;;  %s1337_s18 = smov 0  }
   0x4   :  { %s1339_s19 = smov 0   ;;  %s1341_s20 = smov 0  }
   0x5 LB: > { %s894_s21 = sadd.s32 4294967295, %s1270_s20   ;;  %s895_s22 = sadd.s32 4294967294, %s1270_s20   ;;  %s1270_s20 = sphi %s1341_s20, %s18_s20   ;;  %s1266_s19 = sphi %s1339_s19, %s1576_s19   ;;  %s1262_s18 = sphi %s1337_s18, %s1575_s18   ;;  %s1258_s17 = sphi %s1335_s17, %s1574_s17   ;;  %s1254_s16 = sphi %s1333_s16, %s1573_s16   ;;  %s1250_s15 = sphi %s1331_s15, %s1572_s15  }
   0x6   : > { %s30_s23 = sadd.s32 1, %s1266_s19  ;;  %s140_s24 = sadd.s32 1, %s1258_s17 }
   0x7   : > { %p32_p0 = scmp.ge.s32.totalorder %s30_s23, 2  ;;  %p150_p1 = scmp.ne.s32.totalorder %s1258_s17, %s1254_s16 }
   0x8   : > { %p151_p2 = scmp.eq.s32.totalorder %s894_s21, 1  ;;  %p156_p3 = scmp.ne.s32.totalorder %s1254_s16, %s1250_s15 }
   0x9   : > { %s1578_s23 = smov (%p32_p0, %s30_s23), 0  ;;  %p157_p5 = scmp.eq.s32.totalorder %s895_s22, 1 }
   0xa   : > { %p1371_p4 = por %p151_p2, %p150_p1  ;;  %s135_s26 = ssub.s32 %s1266_s19, %s1578_s23 }
   0xb   : > { %p896_p6 = scmp.ge.s32.totalorder %s1270_s20, 1  ;;  %p138_p7 = scmp.eq.s32.totalorder %s135_s26, 0 }
   0xc   : > { %p1378_p8 = por %p157_p5, %p156_p3  ;;  %p164_p9 = scmp.lt.s32.totalorder %s1270_s20, 3 }
   0xd   : > { %s1384_s28 = scalar_select %p138_p7, %s1258_s17, %s140_s24  }
   0xe   : > { %p1386_p10 = pnand %p896_p6, %p164_p9  ;;  %p1390_p11 = scmp.eq.s32.totalorder %s894_s21, 0 }
   0xf   : > { %s177_s7 = sshll.u32 %s1566_s3, 4  ;;  %s178_s7 = int_to_ptr.vmem [resolvable:$true] %s177_s7 }
  0x10   : > { %p980_p12 = pneg %p1386_p10  ;;  %s1175_s8 = scalar_lea.vmem %s178_s7, 16 }
  0x11   : > { %p1176_p0 = scmp.ne.s32.totalorder %s178_s7, %s1175_s8  ;;  %p1183_p5 = scmp.lt.s32.totalorder %s178_s7, %s178_s7 }
  0x12   : > { %p981_p13 = pnand %p1390_p11, %p980_p12  ;;  %p1184_p6 = scmp.lt.s32.totalorder %s1175_s8, %s1175_s8 }
  0x14   : > { %p1177_p1 = pneg %p981_p13  ;;  %p1185_p7 = por %p1184_p6, %p1183_p5 }
  0x16   : > { %p1178_p2 = pnand %p1177_p1, %p1176_p0 }
  0x18   : > { %p1179_p3 = pneg %p1178_p2 }
  0x1a   : > { %p1186_p9 = pnand %p1185_p7, %p1179_p3 }
  0x1c   : > { %1189 = shalt.err (!%p1186_p9)
}
  0x1d   : > { %s1272_s9 = smov [#allocation2]   ;;  %214 = sbr.rel (%p1386_p10) target bundleno = 619 (0x26b), region = 36 }
  0x1e   : > { %983 = dma.vmem_to_smem (!%p981_p13), %s178_s7, 16, %s1272_s9, [#allocation4]  }
  0x22   : > { %1241 = dma.done.wait (%p1390_p11), [#allocation4], 16  }
  0x23   : > { %1243 = vsyncadd (%p1390_p11), [#allocation4], 4294967280 }
  0x24   : > { %220 = sfence }
  0x25   : > { %p251_p12 = scmp.lt.s32.totalorder %s1262_s18, 1  ;;  %v1273_v0 = vmov 2   ;;  %v1274_v1 = vmov 0   ;;  %v1275_v3 = vmov 3   ;;  %v1276_v4 = vmov 1   ;;  %s279_s29 = sld [smem:[#allocation2]] }
  0x26   : > { %1074 = vset.pattern.permute.xlu1 %v1273_v0  ;;  %1072 = vset.pattern.permute.xlu0 %v1274_v1  ;;  %v1277_v5 = vmov 4   ;;  %v1278_v6 = vmov 5   ;;  %v1279_v7 = vmov 6   ;;  %v1280_v8 = vmov 8   ;;  %s907_s30 = sld [smem:[#allocation2 + $0x1]] }
  0x27   : > { %s1409_s10 = scalar_select %p251_p12, %s1262_s18, 1  ;;  %v1281_v9 = vmov 7   ;;  %v1282_v10 = vmov 11   ;;  %v1283_v11 = vmov 9   ;;  %v1284_v12 = vmov 14  }
  0x28   : > { %v1285_v13 = vmov 10   ;;  %v1286_v14 = vmov 17   ;;  %v1287_v15 = vmov 12   ;;  %v1288_v16 = vmov 20   ;;  %s909_s5 = sld [smem:[#allocation2 + $0x2]] }
  0x29   : > { %s902_s11 = sshll.u32 %s1409_s10, 3  ;;  %v1289_v17 = vmov 13   ;;  %v1290_v18 = vmov 23   ;;  %v1291_v19 = vmov 15   ;;  %v1292_v20 = vmov 26   ;;  %s973_s21 = sshll.u32 %s1409_s10, 5 }
  0x2a   : > { %s257_s14 = scalar_lea.vmem %s1563_s0, %s902_s11  ;;  %v1293_v21 = vmov 16   ;;  %v1294_v22 = vmov 29   ;;  %v1295_v23 = vmov 18   ;;  %v1296_v24 = vmov 31   ;;  %s1453_s26 = scalar_lea.vmem %s1564_s1, %s973_s21 }
  0x2b   : > { %v1415_v2 = vld [vmem:[%s257_s14] sm:$0xff]  ;;  %v1297_v25 = vmov 19   ;;  %v1298_v26 = vmov 21   ;;  %v1299_v27 = vmov 22   ;;  %v1300_v28 = vmov 24   ;;  %s1462_s6 = sld [smem:[#allocation2 + $0x3]] }
  0x2c   : > { %300 = vperm.xlu1 %1074, %v1415_v2   ;;  %270 = vperm.xlu0 %1072, %v1415_v2   ;;  %v1301_v29 = vmov 25   ;;  %v1302_v30 = vmov 27   ;;  %v1303_v31 = vmov 28   ;;  %v1304_v32 = vmov 30   ;;  %v905_v33 = vld [vmem:[%s1453_s26] ss:$0 sm:$0xff] }
  0x2d   : > { %v908_v36 = vld [vmem:[%s1453_s26 + $0x2] ss:$0 sm:$0xff]  ;;  %v906_v38 = vld [vmem:[%s1453_s26 + $0x1] ss:$0 sm:$0xff]  ;;  %v910_v40 = vld [vmem:[%s1453_s26 + $0x3] ss:$0 sm:$0xff]  ;;  %v280_v57 = vstv %s279_s29 }
  0x2e   : > { %v912_v45 = vld [vmem:[%s1453_s26 + $0x4] ss:$0 sm:$0xff]  ;;  %v914_v46 = vld [vmem:[%s1453_s26 + $0x5] ss:$0 sm:$0xff]  ;;  %v916_v51 = vld [vmem:[%s1453_s26 + $0x6] ss:$0 sm:$0xff]  ;;  %v295_v60 = vstv %s907_s30 }
  0x2f   : > { %v920_v53 = vld [vmem:[%s1453_s26 + $0x8] ss:$0 sm:$0xff]  ;;  %s1465_s7 = sld [smem:[#allocation2 + $0x4]]  ;;  %v918_v58 = vld [vmem:[%s1453_s26 + $0x7] ss:$0 sm:$0xff] }
  0x30   : > { %1075 = vset.pattern.permute.xlu1 %v1275_v3  ;;  %1073 = vset.pattern.permute.xlu0 %v1276_v4  ;;  %s1467_s8 = sld [smem:[#allocation2 + $0x5]]  ;;  %v922_v4 = vld [vmem:[%s1453_s26 + $0x9] ss:$0 sm:$0xff] }
  0x31   : > { %315 = vperm.xlu1 %1075, %v1415_v2   ;;  %285 = vperm.xlu0 %1073, %v1415_v2   ;;  %s1470_s9 = sld [smem:[#allocation2 + $0x6]] }
  0x32   : > { %s1477_s11 = sld [smem:[#allocation2 + $0x7]] }
  0x33   : > { %s1479_s12 = sld [smem:[#allocation2 + $0x8]] }
  0x34   : > { %s923_s13 = sld [smem:[#allocation2 + $0x9]] }
  0x35   : > { %1076 = vset.pattern.permute.xlu1 %v1277_v5  ;;  %1077 = vset.pattern.permute.xlu0 %v1278_v6  ;;  %v325_v6 = vstv %s1462_s6  ;;  %s925_s14 = sld [smem:[#allocation2 + $0xa]] }
  0x36   : > { %330 = vperm.xlu1 %1076, %v1415_v2   ;;  %345 = vperm.xlu0 %1077, %v1415_v2   ;;  %s1487_s21 = sld [smem:[#allocation2 + $0xb]] }
  0x37   : > { %s929_s22 = sld [smem:[#allocation2 + $0xc]] }
  0x38   : > { %s931_s24 = sld [smem:[#allocation2 + $0xd]] }
  0x39   : > { %s1493_s29 = sld [smem:[#allocation2 + $0xe]] }
  0x3a   : > { %1078 = vset.pattern.permute.xlu1 %v1279_v7  ;;  %1080 = vset.pattern.permute.xlu0 %v1280_v8  ;;  %v340_v7 = vstv %s1465_s7  ;;  %s935_s30 = sld [smem:[#allocation2 + $0xf]] }
  0x3b   : > { %360 = vperm.xlu1 %1078, %v1415_v2   ;;  %390 = vperm.xlu0 %1080, %v1415_v2   ;;  %s1499_s6 = sld [smem:[#allocation2 + $0x11]] }
  0x3c   : > { %s941_s7 = sld [smem:[#allocation2 + $0x12]] }
  0x3f   : > { %1079 = vset.pattern.permute.xlu1 %v1281_v9  ;;  %1083 = vset.pattern.permute.xlu0 %v1282_v10 }
  0x40   : > { %375 = vperm.xlu1 %1079, %v1415_v2   ;;  %435 = vperm.xlu0 %1083, %v1415_v2  }
  0x44   : > { %1081 = vset.pattern.permute.xlu1 %v1283_v11  ;;  %1086 = vset.pattern.permute.xlu0 %v1284_v12  ;;  %v926_v11 = vld [vmem:[%s1453_s26 + $0xb] ss:$0 sm:$0xff] }
  0x45   : > { %405 = vperm.xlu1 %1081, %v1415_v2   ;;  %480 = vperm.xlu0 %1086, %v1415_v2  }
  0x49   : > { %1082 = vset.pattern.permute.xlu1 %v1285_v13  ;;  %1089 = vset.pattern.permute.xlu0 %v1286_v14  ;;  %v355_v14 = vstv %s1467_s8  ;;  %s943_s8 = sld [smem:[#allocation2 + $0x13]] }
  0x4a   : > { %420 = vperm.xlu1 %1082, %v1415_v2   ;;  %525 = vperm.xlu0 %1089, %v1415_v2  }
  0x4e   : > { %1084 = vset.pattern.permute.xlu1 %v1287_v15  ;;  %1092 = vset.pattern.permute.xlu0 %v1288_v16 }
  0x4f   : > { %450 = vperm.xlu1 %1084, %v1415_v2   ;;  %570 = vperm.xlu0 %1092, %v1415_v2  }
  0x53   : > { %1085 = vset.pattern.permute.xlu1 %v1289_v17  ;;  %1095 = vset.pattern.permute.xlu0 %v1290_v18 }
  0x54   : > { %465 = vperm.xlu1 %1085, %v1415_v2   ;;  %615 = vperm.xlu0 %1095, %v1415_v2  }
  0x58   : > { %1087 = vset.pattern.permute.xlu1 %v1291_v19  ;;  %1098 = vset.pattern.permute.xlu0 %v1292_v20  ;;  %v924_v20 = vld [vmem:[%s1453_s26 + $0xa] ss:$0 sm:$0xff] }
  0x59   : > { %495 = vperm.xlu1 %1087, %v1415_v2   ;;  %660 = vperm.xlu0 %1098, %v1415_v2  }
  0x5d   : > { %1088 = vset.pattern.permute.xlu1 %v1293_v21  ;;  %1101 = vset.pattern.permute.xlu0 %v1294_v22 }
  0x5e   : > { %510 = vperm.xlu1 %1088, %v1415_v2   ;;  %705 = vperm.xlu0 %1101, %v1415_v2  }
  0x62   : > { %1090 = vset.pattern.permute.xlu1 %v1295_v23  ;;  %1104 = vset.pattern.permute.xlu0 %v1296_v24 }
  0x63   : > { %540 = vperm.xlu1 %1090, %v1415_v2  }
  0x67   : > { %1091 = vset.pattern.permute.xlu1 %v1297_v25 }
  0x68   : > { %555 = vperm.xlu1 %1091, %v1415_v2  }
  0x6c   : > { %1093 = vset.pattern.permute.xlu1 %v1298_v26 }
  0x6d   : > { %585 = vperm.xlu1 %1093, %v1415_v2  }
  0x71   : > { %1094 = vset.pattern.permute.xlu1 %v1299_v27 }
  0x72   : > { %600 = vperm.xlu1 %1094, %v1415_v2  }
  0x76   : > { %1096 = vset.pattern.permute.xlu1 %v1300_v28 }
  0x77   : > { %630 = vperm.xlu1 %1096, %v1415_v2  }
  0x7b   : > { %1097 = vset.pattern.permute.xlu1 %v1301_v29 }
  0x7c   : > { %645 = vperm.xlu1 %1097, %v1415_v2  }
  0x80   : > { %1099 = vset.pattern.permute.xlu1 %v1302_v30 }
  0x81   : > { %675 = vperm.xlu1 %1099, %v1415_v2  }
  0x85   : > { %1100 = vset.pattern.permute.xlu1 %v1303_v31  ;;  %v928_v31 = vld [vmem:[%s1453_s26 + $0xc] ss:$0 sm:$0xff] }
  0x86   : > { %690 = vperm.xlu1 %1100, %v1415_v2  }
  0x8a   : > { %1102 = vset.pattern.permute.xlu1 %v1304_v32  ;;  %v385_v32 = vstv %s1477_s11  ;;  %s947_s11 = sld [smem:[#allocation2 + $0x15]] }
  0x8b   : > { %720 = vperm.xlu1 %1102, %v1415_v2  }
  0x8f   : > { %1103 = vset.pattern.permute.xlu1 %v1296_v24  ;;  %v370_v24 = vstv %s1470_s9  ;;  %s1505_s9 = sld [smem:[#allocation2 + $0x14]] }
  0x90   : > { %735 = vperm.xlu1 %1103, %v1415_v2   ;;  %v310_v2 = vstv %s909_s5  ;;  %s937_s5 = sld [smem:[#allocation2 + $0x10]] }
  0xa7   : > { %v301_v34 = vpop.permute.xlu1 %300  ;;  %v271_v35 = vpop.permute.xlu0 %270 }
  0xa8   : > { %v277_v37 = vadd.f32 %v905_v33, %v271_v35  ;;  %v307_v39 = vadd.f32 %v908_v36, %v301_v34  ;;  %v932_v35 = vld [vmem:[%s1453_s26 + $0xe] ss:$0 sm:$0xff] }
  0xaa   : > { %1105 = vtanh.f32 %v277_v37 }
  0xab   : > { %1107 = vtanh.f32 %v307_v39 }
  0xac   : > { %v316_v41 = vpop.permute.xlu1 %315  ;;  %v286_v42 = vpop.permute.xlu0 %285 }
  0xad   : > { %v292_v43 = vadd.f32 %v906_v38, %v286_v42  ;;  %v322_v44 = vadd.f32 %v910_v40, %v316_v41  ;;  %v400_v38 = vstv %s1479_s12  ;;  %v930_v42 = vld [vmem:[%s1453_s26 + $0xd] ss:$0 sm:$0xff]  ;;  %s949_s12 = sld [smem:[#allocation2 + $0x16]] }
  0xaf   : > { %1109 = vtanh.f32 %v292_v43 }
  0xb0   : > { %1111 = vtanh.f32 %v322_v44 }
  0xb1   : > { %v331_v47 = vpop.permute.xlu1 %330  ;;  %v346_v48 = vpop.permute.xlu0 %345 }
  0xb2   : > { %v337_v49 = vadd.f32 %v912_v45, %v331_v47  ;;  %v352_v50 = vadd.f32 %v914_v46, %v346_v48  ;;  %v415_v46 = vstv %s923_s13  ;;  %s1511_s13 = sld [smem:[#allocation2 + $0x17]] }
  0xb4   : > { %1113 = vtanh.f32 %v337_v49 }
  0xb5   : > { %1115 = vtanh.f32 %v352_v50 }
  0xb6   : > { %v361_v52 = vpop.permute.xlu1 %360  ;;  %v391_v54 = vpop.permute.xlu0 %390 }
  0xb7   : > { %v367_v55 = vadd.f32 %v916_v51, %v361_v52  ;;  %v1106_v56 = vpop.eup %1105  ;;  %v397_v59 = vadd.f32 %v920_v53, %v391_v54  ;;  %v934_v52 = vld [vmem:[%s1453_s26 + $0xf] ss:$0 sm:$0xff]  ;;  %v430_v53 = vstv %s925_s14  ;;  %s953_s14 = sld [smem:[#allocation2 + $0x18]] }
  0xb8   : > { %v1108_v62 = vpop.eup %1107  ;;  %v281_v63 = vmul.f32 %v1106_v56, %v280_v57  ;;  %v938_v56 = vld [vmem:[%s1453_s26 + $0x11] ss:$0 sm:$0xff] }
  0xb9   : > { %1117 = vtanh.f32 %v367_v55  ;;  %v311_v8 = vmul.f32 %v1108_v62, %v310_v2 }
  0xba   : > { %1119 = vtanh.f32 %v397_v59  ;;  %v445_v59 = vstv %s1487_s21  ;;  %s955_s21 = sld [smem:[#allocation2 + $0x19]] }
  0xbb   : > { %v376_v61 = vpop.permute.xlu1 %375  ;;  %v436_v12 = vpop.permute.xlu0 %435 }
  0xbc   : > { %v382_v0 = vadd.f32 %v918_v58, %v376_v61  ;;  %v1110_v1 = vpop.eup %1109  ;;  %v442_v21 = vadd.f32 %v926_v11, %v436_v12 }
  0xbd   : > { %v296_v3 = vmul.f32 %v1110_v1, %v295_v60  ;;  %v1112_v5 = vpop.eup %1111 }
  0xbe   : > { %1121 = vtanh.f32 %v382_v0  ;;  %v326_v17 = vmul.f32 %v1112_v5, %v325_v6 }
  0xbf   : > { %v297_v9 = vadd.f32 %v296_v3, %v281_v63  ;;  %v936_v63 = vld [vmem:[%s1453_s26 + $0x10] ss:$0 sm:$0xff]  ;;  %v460_v3 = vstv %s929_s22  ;;  %s957_s22 = sld [smem:[#allocation2 + $0x1a]] }
  0xc0   : > { %v406_v10 = vpop.permute.xlu1 %405  ;;  %v481_v36 = vpop.permute.xlu0 %480 }
  0xc1   : > { %v1114_v13 = vpop.eup %1113  ;;  %v412_v15 = vadd.f32 %v922_v4, %v406_v10  ;;  %v312_v18 = vadd.f32 %v311_v8, %v297_v9  ;;  %v487_v43 = vadd.f32 %v932_v35, %v481_v36  ;;  %v940_v9 = vld [vmem:[%s1453_s26 + $0x12] ss:$0 sm:$0xff]  ;;  %v475_v10 = vstv %s931_s24  ;;  %s959_s24 = sld [smem:[#allocation2 + $0x1b]] }
  0xc2   : > { %v1116_v16 = vpop.eup %1115  ;;  %v341_v19 = vmul.f32 %v1114_v13, %v340_v7  ;;  %v944_v13 = vld [vmem:[%s1453_s26 + $0x14] ss:$0 sm:$0xff] }
  0xc3   : > { %1123 = vtanh.f32 %v412_v15  ;;  %v327_v22 = vadd.f32 %v326_v17, %v312_v18  ;;  %v356_v23 = vmul.f32 %v1116_v16, %v355_v14  ;;  %v490_v16 = vstv %s1493_s29  ;;  %s961_s29 = sld [smem:[#allocation2 + $0x1c]] }
  0xc4   : > { %1125 = vtanh.f32 %v442_v21 }
  0xc5   : > { %v421_v25 = vpop.permute.xlu1 %420  ;;  %v342_v27 = vadd.f32 %v341_v19, %v327_v22  ;;  %v526_v57 = vpop.permute.xlu0 %525 }
  0xc6   : > { %v1118_v26 = vpop.eup %1117  ;;  %v427_v28 = vadd.f32 %v924_v20, %v421_v25  ;;  %v532_v0 = vadd.f32 %v938_v56, %v526_v57  ;;  %v942_v20 = vld [vmem:[%s1453_s26 + $0x13] ss:$0 sm:$0xff] }
  0xc7   : > { %v357_v29 = vadd.f32 %v356_v23, %v342_v27  ;;  %v371_v30 = vmul.f32 %v1118_v26, %v370_v24  ;;  %v1120_v33 = vpop.eup %1119  ;;  %v505_v24 = vstv %s935_s30  ;;  %s963_s30 = sld [smem:[#allocation2 + $0x1d]] }
  0xc8   : > { %1127 = vtanh.f32 %v427_v28  ;;  %v401_v45 = vmul.f32 %v1120_v33, %v400_v38 }
  0xc9   : > { %v372_v40 = vadd.f32 %v371_v30, %v357_v29  ;;  %v946_v30 = vld [vmem:[%s1453_s26 + $0x15] ss:$0 sm:$0xff] }
  0xca   : > { %v451_v34 = vpop.permute.xlu1 %450  ;;  %v571_v14 = vpop.permute.xlu0 %570 }
  0xcb   : > { %v1122_v37 = vpop.eup %1121  ;;  %v457_v39 = vadd.f32 %v928_v31, %v451_v34  ;;  %v577_v21 = vadd.f32 %v944_v13, %v571_v14  ;;  %v520_v31 = vstv %s937_s5  ;;  %v950_v34 = vld [vmem:[%s1453_s26 + $0x17] ss:$0 sm:$0xff]  ;;  %s965_s5 = sld [smem:[#allocation2 + $0x1e]] }
  0xcc   : > { %v386_v41 = vmul.f32 %v1122_v37, %v385_v32  ;;  %v535_v37 = vstv %s1499_s6  ;;  %s967_s6 = sld [smem:[#allocation2 + $0x1f]] }
  0xcd   : > { %1129 = vtanh.f32 %v457_v39 }
  0xce   : > { %v387_v44 = vadd.f32 %v386_v41, %v372_v40  ;;  %1131 = vtanh.f32 %v487_v43  ;;  %v948_v41 = vld [vmem:[%s1453_s26 + $0x16] ss:$0 sm:$0xff] }
  0xcf   : > { %v466_v47 = vpop.permute.xlu1 %465  ;;  %v616_v35 = vpop.permute.xlu0 %615 }
  0xd0   : > { %v1124_v48 = vpop.eup %1123  ;;  %v472_v49 = vadd.f32 %v930_v42, %v466_v47  ;;  %v402_v50 = vadd.f32 %v401_v45, %v387_v44  ;;  %v622_v42 = vadd.f32 %v950_v34, %v616_v35  ;;  %v550_v45 = vstv %s941_s7 }
  0xd1   : > { %v416_v51 = vmul.f32 %v1124_v48, %v415_v46  ;;  %v1126_v54 = vpop.eup %1125  ;;  %v670_v34 = vstv %s957_s22 }
  0xd2   : > { %1133 = vtanh.f32 %v472_v49  ;;  %v446_v2 = vmul.f32 %v1126_v54, %v445_v59 }
  0xd3   : > { %v417_v61 = vadd.f32 %v416_v51, %v402_v50  ;;  %v952_v51 = vld [vmem:[%s1453_s26 + $0x18] ss:$0 sm:$0xff] }
  0xd4   : > { %v496_v55 = vpop.permute.xlu1 %495  ;;  %v661_v56 = vpop.permute.xlu0 %660 }
  0xd5   : > { %v1128_v58 = vpop.eup %1127  ;;  %v502_v60 = vadd.f32 %v934_v52, %v496_v55  ;;  %v565_v52 = vstv %s943_s8  ;;  %v956_v55 = vld [vmem:[%s1453_s26 + $0x1a] ss:$0 sm:$0xff]  ;;  %s265_s8 = scalar_lea.vmem %s1565_s2, %s1409_s10  ;;  %s248_s10 = sand.u32 1, %s1254_s16  }
  0xd6   : > { %v431_v62 = vmul.f32 %v1128_v58, %v430_v53  ;;  %v580_v58 = vstv %s1505_s9  ;;  %s901_s9 = sshll.u32 %s248_s10, 3 }
  0xd7   : > { %1135 = vtanh.f32 %v502_v60 }
  0xd8   : > { %v432_v1 = vadd.f32 %v431_v62, %v417_v61  ;;  %1137 = vtanh.f32 %v532_v0  ;;  %v954_v62 = vld [vmem:[%s1453_s26 + $0x19] ss:$0 sm:$0xff] }
  0xd9   : > { %v511_v4 = vpop.permute.xlu1 %510  ;;  %v706_v13 = vpop.permute.xlu0 %705 }
  0xda   : > { %v1130_v5 = vpop.eup %1129  ;;  %v517_v6 = vadd.f32 %v936_v63, %v511_v4  ;;  %v447_v7 = vadd.f32 %v446_v2, %v432_v1  ;;  %v667_v63 = vadd.f32 %v956_v55, %v661_v56  ;;  %v595_v2 = vstv %s947_s11  ;;  %s970_s11 = sshll.u32 %s1262_s18, 7 }
  0xdb   : > { %v461_v8 = vmul.f32 %v1130_v5, %v460_v3  ;;  %v1132_v11 = vpop.eup %1131  ;;  %v730_v55 = vstv %s965_s5  ;;  %s788_s22 = scalar_lea.hbm %s1567_s4, %s970_s11 }
  0xdc   : > { %1139 = vtanh.f32 %v517_v6  ;;  %v491_v23 = vmul.f32 %v1132_v11, %v490_v16 }
  0xdd   : > { %v462_v18 = vadd.f32 %v461_v8, %v447_v7  ;;  %v958_v8 = vld [vmem:[%s1453_s26 + $0x1b] ss:$0 sm:$0xff] }
  0xde   : > { %v541_v12 = vpop.permute.xlu1 %540 }
  0xdf   : > { %v1134_v15 = vpop.eup %1133  ;;  %v547_v17 = vadd.f32 %v940_v9, %v541_v12  ;;  %v610_v9 = vstv %s949_s12  ;;  %v962_v12 = vld [vmem:[%s1453_s26 + $0x1d] ss:$0 sm:$0xff]  ;;  %s250_s12 = scalar_lea.vmem [#allocation5], %s901_s9 }
  0xe0   : > { %v476_v19 = vmul.f32 %v1134_v15, %v475_v10  ;;  %v625_v15 = vstv %s1511_s13  ;;  %s790_s13 = sshll.u32 %s250_s12, 4  ;;  %s791_s13 = int_to_ptr.vmem [resolvable:$true] %s790_s13 }
  0xe1   : > { %1141 = vtanh.f32 %v547_v17 }
  0xe2   : > { %v477_v22 = vadd.f32 %v476_v19, %v462_v18  ;;  %1143 = vtanh.f32 %v577_v21  ;;  %v960_v19 = vld [vmem:[%s1453_s26 + $0x1c] ss:$0 sm:$0xff] }
  0xe3   : > { %v556_v25 = vpop.permute.xlu1 %555 }
  0xe4   : > { %v1136_v26 = vpop.eup %1135  ;;  %v562_v27 = vadd.f32 %v942_v20, %v556_v25  ;;  %v492_v28 = vadd.f32 %v491_v23, %v477_v22  ;;  %v712_v20 = vadd.f32 %v962_v12, %v706_v13  ;;  %v640_v23 = vstv %s953_s14 }
  0xe5   : > { %v506_v29 = vmul.f32 %v1136_v26, %v505_v24  ;;  %v1138_v32 = vpop.eup %1137 }
  0xe6   : > { %1145 = vtanh.f32 %v562_v27  ;;  %v536_v44 = vmul.f32 %v1138_v32, %v535_v37 }
  0xe7   : > { %v507_v39 = vadd.f32 %v506_v29, %v492_v28  ;;  %v964_v29 = vld [vmem:[%s1453_s26 + $0x1e] ss:$0 sm:$0xff] }
  0xe8   : > { %v586_v33 = vpop.permute.xlu1 %585 }
  0xe9   : > { %v1140_v36 = vpop.eup %1139  ;;  %v592_v38 = vadd.f32 %v946_v30, %v586_v33  ;;  %v655_v30 = vstv %s955_s21 }
  0xea   : > { %v521_v40 = vmul.f32 %v1140_v36, %v520_v31 }
  0xeb   : > { %1147 = vtanh.f32 %v592_v38  ;;  %v966_v38 = vld [vmem:[%s1453_s26 + $0x1f] ss:$0 sm:$0xff] }
  0xec   : > { %v522_v43 = vadd.f32 %v521_v40, %v507_v39  ;;  %1149 = vtanh.f32 %v622_v42 }
  0xed   : > { %v601_v46 = vpop.permute.xlu1 %600 }
  0xee   : > { %v1142_v47 = vpop.eup %1141  ;;  %v607_v48 = vadd.f32 %v948_v41, %v601_v46  ;;  %v537_v49 = vadd.f32 %v536_v44, %v522_v43  ;;  %v685_v41 = vstv %s959_s24  ;;  %s776_s24 = scalar_lea.sflag [#allocation3], %s248_s10 }
  0xef   : > { %v551_v50 = vmul.f32 %v1142_v47, %v550_v45  ;;  %v1144_v53 = vpop.eup %1143  ;;  %v700_v47 = vstv %s961_s29  ;;  %s1190_s29 = scalar_lea.vmem %s791_s13, 128 }
  0xf0   : > { %1151 = vtanh.f32 %v607_v48  ;;  %v581_v1 = vmul.f32 %v1144_v53, %v580_v58  ;;  %p1191_p10 = scmp.ne.s32.totalorder %s791_s13, %s1190_s29 }
  0xf1   : > { %v552_v60 = vadd.f32 %v551_v50, %v537_v49  ;;  %v715_v50 = vstv %s963_s30  ;;  %s1305_s30 = smov [#allocation5]  }
  0xf2   : > { %v631_v54 = vpop.permute.xlu1 %630  ;;  %p1192_p11 = pnand %p1191_p10, %p1371_p4  ;;  %s1194_s5 = sshll.u32 %s1305_s30, 4  ;;  %s1195_s5 = int_to_ptr.vmem [resolvable:$false] %s1194_s5 }
  0xf3   : > { %v1146_v57 = vpop.eup %1145  ;;  %v637_v59 = vadd.f32 %v952_v51, %v631_v54  ;;  %s1196_s18 = scalar_lea.vmem %s1195_s5, 256  ;;  %p1197_p0 = scmp.lt.s32.totalorder %s791_s13, %s1195_s5 }
  0xf4   : > { %v566_v61 = vmul.f32 %v1146_v57, %v565_v52  ;;  %p1193_p13 = pneg %p1192_p11  ;;  %p1198_p1 = scmp.lt.s32.totalorder %s1196_s18, %s1190_s29 }
  0xf5   : > { %1153 = vtanh.f32 %v637_v59  ;;  %v745_v59 = vstv %s967_s6 }
  0xf6   : > { %v567_v0 = vadd.f32 %v566_v61, %v552_v60  ;;  %1155 = vtanh.f32 %v667_v63  ;;  %v968_v63 = vld [vmem:[%s265_s8] ss:$0 sm:$0xff]  ;;  %p1199_p2 = por %p1198_p1, %p1197_p0 }
  0xf7   : > { %v646_v3 = vpop.permute.xlu1 %645 }
  0xf8   : > { %v1148_v4 = vpop.eup %1147  ;;  %v652_v5 = vadd.f32 %v954_v62, %v646_v3  ;;  %v582_v6 = vadd.f32 %v581_v1, %v567_v0  ;;  %p1200_p3 = pnand %p1199_p2, %p1193_p13 }
  0xf9   : > { %v596_v7 = vmul.f32 %v1148_v4, %v595_v2  ;;  %v1150_v10 = vpop.eup %1149 }
  0xfa   : > { %1157 = vtanh.f32 %v652_v5  ;;  %v626_v22 = vmul.f32 %v1150_v10, %v625_v15 }
  0xfb   : > { %v597_v17 = vadd.f32 %v596_v7, %v582_v6 }
  0xfc   : > { %v676_v11 = vpop.permute.xlu1 %675 }
  0xfd   : > { %v1152_v14 = vpop.eup %1151  ;;  %v682_v16 = vadd.f32 %v958_v8, %v676_v11 }
  0xfe   : > { %v611_v18 = vmul.f32 %v1152_v14, %v610_v9 }
  0xff   : > { %1159 = vtanh.f32 %v682_v16 }
 0x100   : > { %v612_v21 = vadd.f32 %v611_v18, %v597_v17  ;;  %1161 = vtanh.f32 %v712_v20 }
 0x101   : > { %v691_v24 = vpop.permute.xlu1 %690 }
 0x102   : > { %v1154_v25 = vpop.eup %1153  ;;  %v697_v26 = vadd.f32 %v960_v19, %v691_v24  ;;  %v627_v27 = vadd.f32 %v626_v22, %v612_v21 }
 0x103   : > { %v641_v28 = vmul.f32 %v1154_v25, %v640_v23  ;;  %v1156_v31 = vpop.eup %1155 }
 0x104   : > { %1163 = vtanh.f32 %v697_v26  ;;  %v671_v40 = vmul.f32 %v1156_v31, %v670_v34 }
 0x105   : > { %v642_v36 = vadd.f32 %v641_v28, %v627_v27 }
 0x106   : > { %v721_v32 = vpop.permute.xlu1 %720 }
 0x107   : > { %v1158_v33 = vpop.eup %1157  ;;  %v727_v35 = vadd.f32 %v964_v29, %v721_v32 }
 0x108   : > { %v656_v37 = vmul.f32 %v1158_v33, %v655_v30 }
 0x109   : > { %1165 = vtanh.f32 %v727_v35 }
 0x10a   : > { %v657_v39 = vadd.f32 %v656_v37, %v642_v36 }
 0x10b   : > { %v736_v42 = vpop.permute.xlu1 %735 }
 0x10c   : > { %v1160_v43 = vpop.eup %1159  ;;  %v742_v44 = vadd.f32 %v966_v38, %v736_v42  ;;  %v672_v46 = vadd.f32 %v671_v40, %v657_v39 }
 0x10d   : > { %v686_v45 = vmul.f32 %v1160_v43, %v685_v41  ;;  %v1162_v48 = vpop.eup %1161 }
 0x10e   : > { %1167 = vtanh.f32 %v742_v44  ;;  %v716_v54 = vmul.f32 %v1162_v48, %v715_v50 }
 0x10f   : > { %v687_v51 = vadd.f32 %v686_v45, %v672_v46 }
 0x111   : > { %v1164_v49 = vpop.eup %1163 }
 0x112   : > { %v701_v52 = vmul.f32 %v1164_v49, %v700_v47 }
 0x114   : > { %v702_v53 = vadd.f32 %v701_v52, %v687_v51 }
 0x116   : > { %v1166_v56 = vpop.eup %1165  ;;  %v717_v57 = vadd.f32 %v716_v54, %v702_v53 }
 0x117   : > { %v731_v58 = vmul.f32 %v1166_v56, %v730_v55 }
 0x119   : > { %v732_v61 = vadd.f32 %v731_v58, %v717_v57 }
 0x11b   : > { %v1168_v60 = vpop.eup %1167 }
 0x11c   : > { %v746_v62 = vmul.f32 %v1168_v60, %v745_v59 }
 0x11e   : > { %v747_v0 = vadd.f32 %v746_v62, %v732_v61 }
 0x120   : > { %v755_v1 = vadd.f32 %v968_v63, %v747_v0 }
 0x122   : > { %757 = vmax.xlane.f32.xlu0 %v755_v1 }
 0x1ab   : > { %v758_v2 = vpop.xlane.xlu0 %757 }
 0x1ac   : > { %v763_v3 = vsub.f32 %v755_v1, %v758_v2  ;;  %v759_v6 = vsub.f32 -inf, %v758_v2 }
 0x1ae   : > { %v764_v4 = vmul.f32 1.442695, %v763_v3  ;;  %v760_v7 = vmul.f32 1.442695, %v759_v6 }
 0x1b0   : > { %1169 = vpow2.f32 %v764_v4 }
 0x1b1   : > { %1171 = vpow2.f32 %v760_v7 }
 0x1bd   : > { %v1170_v5 = vpop.eup %1169 }
 0x1be   : > { %766 = vadd.xlane.f32.xlu1 %v1170_v5  ;;  %v1172_v8 = vpop.eup %1171 }
 0x1bf   : > { %v762_v9 = vmul.f32 0.0, %v1172_v8 }
 0x247   : > { %v767_v10 = vpop.xlane.xlu1 %766 }
 0x248   : > { %v768_v11 = vadd.f32 %v767_v10, %v762_v9 }
 0x24a   : > { %1173 = vlog2.f32 %v768_v11 }
 0x257   : > { %v1174_v12 = vpop.eup %1173 }
 0x258   : > { %v770_v13 = vmul.f32 0.6931472, %v1174_v12 }
 0x25a   : > { %v771_v14 = vadd.f32 %v770_v13, %v758_v2 }
 0x25c   : > { %v773_v15 = vsub.f32 %v755_v1, %v771_v14 }
 0x25e   : > { %774 = vst [vmem:[%s250_s12] sm:$0xff] %v773_v15 }
 0x25f   : > { %1203 = shalt.err (!%p1200_p3)
}
 0x260   : > { %s1204_s6 = scalar_lea.hbm %s788_s22, 128  ;;  %s1208_s8 = scalar_lea.hbm %s1567_s4, 256 }
 0x261   : > { %p1205_p5 = scmp.ne.s32.totalorder %s788_s22, %s1204_s6  ;;  %p1209_p9 = scmp.lt.s32.totalorder %s788_s22, %s1567_s4 }
 0x262   : > { %p1210_p12 = scmp.lt.s32.totalorder %s1208_s8, %s1204_s6 }
 0x263   : > { %p1206_p6 = pnand %p1205_p5, %p1371_p4 }
 0x264   : > { %p1211_p10 = por %p1210_p12, %p1209_p9 }
 0x265   : > { %p1207_p7 = pneg %p1206_p6 }
 0x267   : > { %p1212_p11 = pnand %p1211_p10, %p1207_p7 }
 0x269   : > { %1215 = shalt.err (!%p1212_p11)
}
 0x26a   : > { %978 = dma.vmem_to_hbm [thread:$0]  (%p1371_p4), %s791_s13, 128, %s788_s22, %s776_s24  }
 0x26b PF: > { %p990_p13 = scmp.ge.s32.totalorder %s1270_s20, 2  ;;  %s802_s11 = sand.u32 1, %s1250_s15  }
 0x26c   : > { %s803_s12 = scalar_lea.sflag [#allocation3], %s802_s11 }
 0x26d   : > { %p985_p0 = pnand %p990_p13, %p1378_p8 }
 0x26f   : > { %p986_p1 = pneg %p985_p0 }
 0x271   : > { %1245 = dma.done.wait (%p986_p1), %s803_s12, 128  }
 0x272   : > { %1247 = vsyncadd (%p986_p1), %s803_s12, 4294967168  ;;  %s18_s20 = sadd.s32 1, %s1270_s20   ;;  %s1572_s15 = smov %s1254_s16 }
 0x273   : > { %p15_p2 = scmp.ge.s32.totalorder %s18_s20, 4   ;;  %s1573_s16 = smov %s1258_s17 }
 0x274   : > { %s1574_s17 = smov %s1384_s28  ;;  %s1575_s18 = smov %s1266_s19 }
 0x275   : > { %s1576_s19 = smov %s1578_s23  ;;  %17 = sbr.rel (!%p15_p2) target bundleno = 5 (0x5), region = 82 }
 0x27a   :  { %808 = vsyncpa [#allocation3], 1 }
 0x27b   :  { %810 = vsyncpa [#allocation3 + $0x1], 1 }
 0x27c   :  { %811 = vsyncpa [#allocation4], 1 }
 0x27d   :  { %813 = vsyncpa [#allocation4 + $0x1], 1 }

</bundles_post_ra>
